<compile_context>
chip_gen: v5e
topology: v5e:2x2
jax: 0.10.0
libtpu: 0.0.40
codegen_flags: <defaults>
</compile_context>

<pallas_src>
import itertools
from collections import namedtuple

import numpy as np
import jax
import jax.numpy as jnp
from jax import lax
from jax.experimental import pallas as pl
from jax.experimental.pallas import tpu as pltpu

State = namedtuple("State", ["obs", "description", "inventory"])


def _round_up(n, m):
    return ((n + m - 1) // m) * m


# ----------------------------------------------------------------------------
# Pallas kernels
# ----------------------------------------------------------------------------
def gru_fused_kernel(x_ref, len_ref, wih_ref, whh_ref, bx_ref, bhn_ref,
                     h_ref, xp_ref):
    """One grid step == one GRU stream.

    x_ref   : (T*B, E)  time-major embedded tokens, flattened over (T, B)
    len_ref : (B, 1)    int32 sequence lengths (0 for padded batch rows)
    wih_ref : (E, 3H)   packed/transposed input weights  [r | z | n]
    whh_ref : (H, 3H)   packed/transposed hidden weights [r | z | n]
    bx_ref  : (1, 3H)   b_ih + [b_hr, b_hz, 0]  (folded into input proj)
    bhn_ref : (1, H)    b_hn (needed inside the r * (...) term)
    h_ref   : (B, H)    final hidden state output
    xp_ref  : (T*B,3H)  VMEM scratch for the hoisted input projection
    """
    TB = x_ref.shape[0]
    B, H = h_ref.shape
    T = TB // B

    # Hoisted input projection: one wide matmul, off the serial critical path.
    xp_ref[...] = (
        jnp.dot(x_ref[...], wih_ref[...], preferred_element_type=jnp.float32)
        + bx_ref[...])

    whh = whh_ref[...]          # hoisted loads
    b_hn = bhn_ref[...]
    lens = len_ref[...]

    def step(t, h):
        base = pl.multiple_of(t * B, B)
        gx = xp_ref[pl.ds(base, B), :]                              # (B, 3H)
        gh = jnp.dot(h, whh, preferred_element_type=jnp.float32)    # (B, 3H)
        r = jax.nn.sigmoid(gx[:, :H] + gh[:, :H])
        z = jax.nn.sigmoid(gx[:, H:2 * H] + gh[:, H:2 * H])
        n = jnp.tanh(gx[:, 2 * H:] + r * (gh[:, 2 * H:] + b_hn))
        h_new = (1.0 - z) * n + z * h
        # masked update past each sequence's end => h at step len-1 survives
        return jnp.where(t < lens, h_new, h)

    h_ref[...] = lax.fori_loop(0, T, step, jnp.zeros((B, H), jnp.float32),
                               unroll=True)


def q_head_kernel(x_ref, wh_ref, bh_ref, ws_ref, bs_ref, q_ref):
    """z = relu(x @ Wh + bh); q = sum(z * ws, -1) + bs.  x: (N,4H), q: (N,1)."""
    z = jnp.dot(x_ref[...], wh_ref[...], preferred_element_type=jnp.float32)
    z = jnp.maximum(z + bh_ref[...], 0.0)
    # H -> 1 scorer as VPU multiply + row reduce (avoid a 1-wide MXU matmul).
    q_ref[...] = jnp.sum(z * ws_ref[...], axis=-1, keepdims=True) + bs_ref[...]


# ----------------------------------------------------------------------------
# Pallas wrappers
# ----------------------------------------------------------------------------
def gru_fused(x, lens, wih, whh, bx, bhn):
    """x: (G, T*B, E);  returns (G, B, H) final hidden states."""
    G, TB, E = x.shape
    B = lens.shape[1]
    H = bhn.shape[-1]
    grid_spec = pltpu.PrefetchScalarGridSpec(
        num_scalar_prefetch=0,
        grid=(G,),
        in_specs=[
            pl.BlockSpec((None, TB, E), lambda g: (g, 0, 0)),
            pl.BlockSpec((None, B, 1), lambda g: (g, 0, 0)),
            pl.BlockSpec((None, E, 3 * H), lambda g: (g, 0, 0)),
            pl.BlockSpec((None, H, 3 * H), lambda g: (g, 0, 0)),
            pl.BlockSpec((None, 1, 3 * H), lambda g: (g, 0, 0)),
            pl.BlockSpec((None, 1, H), lambda g: (g, 0, 0)),
        ],
        out_specs=pl.BlockSpec((None, B, H), lambda g: (g, 0, 0)),
        scratch_shapes=[pltpu.VMEM((TB, 3 * H), jnp.float32)],
    )
    return pl.pallas_call(
        gru_fused_kernel,
        out_shape=jax.ShapeDtypeStruct((G, B, H), jnp.float32),
        grid_spec=grid_spec,
        compiler_params=pltpu.CompilerParams(
            dimension_semantics=("parallel",)),
    )(x, lens, wih, whh, bx, bhn)


def q_head(x, w_h, b_h, w_s, b_s):
    N = x.shape[0]
    vmem = pl.BlockSpec(memory_space=pltpu.MemorySpace.VMEM)
    return pl.pallas_call(
        q_head_kernel,
        out_shape=jax.ShapeDtypeStruct((N, 1), jnp.float32),
        in_specs=[vmem] * 5,
        out_specs=vmem,
    )(x, w_h.T, b_h.reshape(1, -1), w_s.reshape(1, -1), b_s.reshape(1, 1))


# ----------------------------------------------------------------------------
# Parameter init (mirrors nn.Embedding / nn.GRU / nn.Linear shapes)
# ----------------------------------------------------------------------------
def init_gru(key, e, h):
    k = 1.0 / np.sqrt(h)
    ks = jax.random.split(key, 4)
    return dict(
        w_ih=jax.random.uniform(ks[0], (3 * h, e), jnp.float32, -k, k),
        w_hh=jax.random.uniform(ks[1], (3 * h, h), jnp.float32, -k, k),
        b_ih=jax.random.uniform(ks[2], (3 * h,), jnp.float32, -k, k),
        b_hh=jax.random.uniform(ks[3], (3 * h,), jnp.float32, -k, k),
    )


def init_linear(key, fan_in, fan_out):
    k = 1.0 / np.sqrt(fan_in)
    ks = jax.random.split(key, 2)
    return dict(
        w=jax.random.uniform(ks[0], (fan_out, fan_in), jnp.float32, -k, k),
        b=jax.random.uniform(ks[1], (fan_out,), jnp.float32, -k, k),
    )


def init_drrn(key, vocab_size, embedding_dim, hidden_dim):
    ks = jax.random.split(key, 7)
    return dict(
        emb=jax.random.normal(ks[0], (vocab_size, embedding_dim), jnp.float32),
        obs=init_gru(ks[1], embedding_dim, hidden_dim),
        look=init_gru(ks[2], embedding_dim, hidden_dim),
        inv=init_gru(ks[3], embedding_dim, hidden_dim),
        act=init_gru(ks[4], embedding_dim, hidden_dim),
        hidden=init_linear(ks[5], 4 * hidden_dim, hidden_dim),
        scorer=init_linear(ks[6], hidden_dim, 1),
    )


def pack_gru(gru):
    """Pre-transpose / pack GRU weights so no relayout happens in-kernel."""
    H = gru["w_hh"].shape[-1]
    wih_t = gru["w_ih"].T                 # (E, 3H), columns ordered [r|z|n]
    whh_t = gru["w_hh"].T                 # (H, 3H)
    b_hh = gru["b_hh"]
    bx = gru["b_ih"] + jnp.concatenate(
        [b_hh[:2 * H], jnp.zeros((H,), jnp.float32)])
    return wih_t, whh_t, bx.reshape(1, 3 * H), b_hh[2 * H:].reshape(1, H)


# ----------------------------------------------------------------------------
# Forward pass (mirrors DRRN.forward)
# ----------------------------------------------------------------------------
def drrn_forward(params, state_batch, act_batch):
    state = State(*zip(*state_batch))
    act_sizes = [len(a) for a in act_batch]
    flat_acts = list(itertools.chain.from_iterable(act_batch))
    sizes = np.array(act_sizes, dtype=np.int32)
    splits = np.cumsum(sizes)[:-1]

    # Four streams in one fused Pallas call: [act, obs, look, inv].
    streams = [flat_acts, list(state.obs), list(state.description),
               list(state.inventory)]
    n_act = len(flat_acts)
    B = len(state_batch)
    # Fixed 8-buckets: one compiled kernel, clean (8,128) sublane tiling.
    B_pad = _round_up(max(len(s) for s in streams), 8)
    T_pad = _round_up(max(len(seq) for s in streams for seq in s), 8)

    ids = np.zeros((4, B_pad, T_pad), dtype=np.int32)
    lens = np.zeros((4, B_pad, 1), dtype=np.int32)
    for g, s in enumerate(streams):
        for i, seq in enumerate(s):
            ids[g, i, :len(seq)] = np.asarray(seq, dtype=np.int32)
            lens[g, i, 0] = len(seq)

    # Embedding gather + time-major layout (JAX glue, not the hot path).
    emb = jnp.take(params["emb"], jnp.asarray(ids), axis=0)    # (4, B, T, E)
    x = jnp.transpose(emb, (0, 2, 1, 3)).reshape(4, T_pad * B_pad, -1)

    packed = [pack_gru(params[k]) for k in ("act", "obs", "look", "inv")]
    wih = jnp.stack([p[0] for p in packed])       # (4, E, 3H)
    whh = jnp.stack([p[1] for p in packed])       # (4, H, 3H)
    bx = jnp.stack([p[2] for p in packed])        # (4, 1, 3H)
    bhn = jnp.stack([p[3] for p in packed])       # (4, 1, H)

    h_all = gru_fused(x, jnp.asarray(lens), wih, whh, bx, bhn)  # (4, B_pad, H)

    act_out = h_all[0, :n_act]
    obs_out, look_out, inv_out = h_all[1, :B], h_all[2, :B], h_all[3, :B]

    state_out = jnp.concatenate([obs_out, look_out, inv_out], axis=1)  # (B,3H)
    state_rep = jnp.repeat(state_out, sizes, axis=0)                   # (N,3H)
    z_in = jnp.concatenate([state_rep, act_out], axis=1)               # (N,4H)

    n_pad = _round_up(n_act, 8)
    z_in = jnp.pad(z_in, ((0, n_pad - n_act), (0, 0)))
    q = q_head(z_in, params["hidden"]["w"], params["hidden"]["b"],
               params["scorer"]["w"], params["scorer"]["b"])           # (n_pad,1)
    q = q[:n_act, 0]
    return jnp.split(q, splits)


# ----------------------------------------------------------------------------
# Driver
# ----------------------------------------------------------------------------
if __name__ == "__main__":
    vocab_size, embedding_dim, hidden_dim = 50, 16, 32

    key = jax.random.PRNGKey(0)
    pkey, dkey = jax.random.split(key)
    params = init_drrn(pkey, vocab_size, embedding_dim, hidden_dim)

    def rand_seq(k, length):
        return [int(t) for t in jax.random.randint(k, (length,), 1, vocab_size)]

    dkeys = jax.random.split(dkey, 16)
    # Two states: (obs, description, inventory) unpadded id sequences.
    state_batch = [
        State(obs=rand_seq(dkeys[0], 5), description=rand_seq(dkeys[1], 4),
              inventory=rand_seq(dkeys[2], 3)),
        State(obs=rand_seq(dkeys[3], 7), description=rand_seq(dkeys[4], 6),
              inventory=rand_seq(dkeys[5], 5)),
    ]
    # Admissible actions: 3 for state 0, 2 for state 1.
    act_batch = [
        [rand_seq(dkeys[6], 2), rand_seq(dkeys[7], 4), rand_seq(dkeys[8], 3)],
        [rand_seq(dkeys[9], 5), rand_seq(dkeys[10], 2)],
    ]

    q_values = drrn_forward(params, state_batch, act_batch)
    jax.block_until_ready(q_values)

    assert len(q_values) == 2
    assert q_values[0].shape == (3,) and q_values[1].shape == (2,)
    assert all(bool(jnp.all(jnp.isfinite(q))) for q in q_values)
    print("KERNEL_OK")
</pallas_src>

<mosaic_0001>
module attributes {stable_mosaic.version = 11 : i64} {
  func.func @gru_fused_kernel(%arg0: i32, %arg1: memref<1x64x16xf32, #tpu.memory_space<vmem>>, %arg2: memref<1x8x1xi32, #tpu.memory_space<vmem>>, %arg3: memref<1x16x96xf32, #tpu.memory_space<vmem>>, %arg4: memref<1x32x96xf32, #tpu.memory_space<vmem>>, %arg5: memref<1x1x96xf32, #tpu.memory_space<vmem>>, %arg6: memref<1x1x32xf32, #tpu.memory_space<vmem>>, %arg7: memref<1x8x32xf32, #tpu.memory_space<vmem>>, %arg8: memref<64x96xf32, #tpu.memory_space<vmem>>) attributes {dimension_semantics = [#tpu.dimension_semantics<parallel>], iteration_bounds = array<i64: 4>, scalar_prefetch = 0 : i64, scratch_operands = 1 : i64, tpu.core_type = #tpu.core_type<tc>, window_params = [{transform_indices = @transform_0, window_bounds = array<i64: 1, 64, 16>}, {transform_indices = @transform_1, window_bounds = array<i64: 1, 8, 1>}, {transform_indices = @transform_2, window_bounds = array<i64: 1, 16, 96>}, {transform_indices = @transform_3, window_bounds = array<i64: 1, 32, 96>}, {transform_indices = @transform_4, window_bounds = array<i64: 1, 1, 96>}, {transform_indices = @transform_5, window_bounds = array<i64: 1, 1, 32>}, {transform_indices = @transform_6, window_bounds = array<i64: 1, 8, 32>}]} {
    %c0 = arith.constant 0 : index
    %c0_0 = arith.constant 0 : index
    %c0_1 = arith.constant 0 : index
    %0 = vector.load %arg1[%c0, %c0_0, %c0_1] : memref<1x64x16xf32, #tpu.memory_space<vmem>>, vector<1x64x16xf32>
    %1 = vector.shape_cast %0 : vector<1x64x16xf32> to vector<64x16xf32>
    %c0_2 = arith.constant 0 : index
    %c0_3 = arith.constant 0 : index
    %c0_4 = arith.constant 0 : index
    %2 = vector.load %arg3[%c0_2, %c0_3, %c0_4] : memref<1x16x96xf32, #tpu.memory_space<vmem>>, vector<1x16x96xf32>
    %3 = vector.shape_cast %2 : vector<1x16x96xf32> to vector<16x96xf32>
    %cst = arith.constant dense<0.000000e+00> : vector<64x96xf32>
    %4 = tpu.matmul %1, %3, %cst {dimension_numbers = #tpu.dot_dimension_numbers<[1], [0], [0], [1], [0, 0, 1, 1], [], []>} : vector<64x16xf32>, vector<16x96xf32>, vector<64x96xf32> -> vector<64x96xf32>
    %c0_5 = arith.constant 0 : index
    %c0_6 = arith.constant 0 : index
    %c0_7 = arith.constant 0 : index
    %5 = vector.load %arg5[%c0_5, %c0_6, %c0_7] : memref<1x1x96xf32, #tpu.memory_space<vmem>>, vector<1x1x96xf32>
    %6 = vector.shape_cast %5 : vector<1x1x96xf32> to vector<1x96xf32>
    %7 = vector.broadcast %6 : vector<1x96xf32> to vector<64x96xf32>
    %8 = arith.addf %4, %7 : vector<64x96xf32>
    %c0_8 = arith.constant 0 : index
    %c0_9 = arith.constant 0 : index
    %9 = vector.load %arg8[%c0_8, %c0_9] : memref<64x96xf32, #tpu.memory_space<vmem>>, vector<64x96xf32>
    tpu.vector_store %arg8[%c0_8, %c0_9], %8 {strides = array<i32>} : memref<64x96xf32, #tpu.memory_space<vmem>>, vector<64x96xf32>,
    %c0_10 = arith.constant 0 : index
    %c0_11 = arith.constant 0 : index
    %c0_12 = arith.constant 0 : index
    %10 = vector.load %arg4[%c0_10, %c0_11, %c0_12] : memref<1x32x96xf32, #tpu.memory_space<vmem>>, vector<1x32x96xf32>
    %11 = vector.shape_cast %10 : vector<1x32x96xf32> to vector<32x96xf32>
    %c0_13 = arith.constant 0 : index
    %c0_14 = arith.constant 0 : index
    %c0_15 = arith.constant 0 : index
    %12 = vector.load %arg6[%c0_13, %c0_14, %c0_15] : memref<1x1x32xf32, #tpu.memory_space<vmem>>, vector<1x1x32xf32>
    %13 = vector.shape_cast %12 : vector<1x1x32xf32> to vector<1x32xf32>
    %c0_16 = arith.constant 0 : index
    %c0_17 = arith.constant 0 : index
    %c0_18 = arith.constant 0 : index
    %14 = vector.load %arg2[%c0_16, %c0_17, %c0_18] : memref<1x8x1xi32, #tpu.memory_space<vmem>>, vector<1x8x1xi32>
    %15 = vector.shape_cast %14 : vector<1x8x1xi32> to vector<8x1xi32>
    %cst_19 = arith.constant 0.000000e+00 : f32
    %16 = vector.broadcast %cst_19 : f32 to vector<8x32xf32>
    %c0_i32 = arith.constant 0 : i32
    %c8_i32 = arith.constant 8 : i32
    %17 = arith.muli %c0_i32, %c8_i32 : i32
    %18 = tpu.assume_multiple %17, 8 : i32
    %19 = arith.index_cast %18 : i32 to index
    %c0_20 = arith.constant 0 : index
    %20 = vector.load %arg8[%19, %c0_20] : memref<64x96xf32, #tpu.memory_space<vmem>>, vector<8x96xf32>
    %cst_21 = arith.constant dense<0.000000e+00> : vector<8x96xf32>
    %21 = tpu.matmul %16, %11, %cst_21 {dimension_numbers = #tpu.dot_dimension_numbers<[1], [0], [0], [1], [0, 0, 1, 1], [], []>} : vector<8x32xf32>, vector<32x96xf32>, vector<8x96xf32> -> vector<8x96xf32>
    %22 = vector.extract_strided_slice %20 {offsets = [0, 0], sizes = [8, 32], strides = [1, 1]} : vector<8x96xf32> to vector<8x32xf32>
    %23 = vector.extract_strided_slice %21 {offsets = [0, 0], sizes = [8, 32], strides = [1, 1]} : vector<8x96xf32> to vector<8x32xf32>
    %24 = arith.addf %22, %23 : vector<8x32xf32>
    %25 = arith.negf %24 : vector<8x32xf32>
    %26 = math.exp %25 : vector<8x32xf32>
    %cst_22 = arith.constant 1.000000e+00 : f32
    %27 = vector.broadcast %cst_22 : f32 to vector<8x32xf32>
    %28 = arith.addf %27, %26 : vector<8x32xf32>
    %29 = arith.divf %27, %28 : vector<8x32xf32>
    %30 = vector.extract_strided_slice %20 {offsets = [0, 32], sizes = [8, 32], strides = [1, 1]} : vector<8x96xf32> to vector<8x32xf32>
    %31 = vector.extract_strided_slice %21 {offsets = [0, 32], sizes = [8, 32], strides = [1, 1]} : vector<8x96xf32> to vector<8x32xf32>
    %32 = arith.addf %30, %31 : vector<8x32xf32>
    %33 = arith.negf %32 : vector<8x32xf32>
    %34 = math.exp %33 : vector<8x32xf32>
    %cst_23 = arith.constant 1.000000e+00 : f32
    %35 = vector.broadcast %cst_23 : f32 to vector<8x32xf32>
    %36 = arith.addf %35, %34 : vector<8x32xf32>
    %37 = arith.divf %35, %36 : vector<8x32xf32>
    %38 = vector.extract_strided_slice %20 {offsets = [0, 64], sizes = [8, 32], strides = [1, 1]} : vector<8x96xf32> to vector<8x32xf32>
    %39 = vector.extract_strided_slice %21 {offsets = [0, 64], sizes = [8, 32], strides = [1, 1]} : vector<8x96xf32> to vector<8x32xf32>
    %40 = vector.broadcast %13 : vector<1x32xf32> to vector<8x32xf32>
    %41 = arith.addf %39, %40 : vector<8x32xf32>
    %42 = arith.mulf %29, %41 : vector<8x32xf32>
    %43 = arith.addf %38, %42 : vector<8x32xf32>
    %44 = math.tanh %43 : vector<8x32xf32>
    %cst_24 = arith.constant 1.000000e+00 : f32
    %45 = vector.broadcast %cst_24 : f32 to vector<8x32xf32>
    %46 = arith.subf %45, %37 : vector<8x32xf32>
    %47 = arith.mulf %46, %44 : vector<8x32xf32>
    %48 = arith.mulf %37, %16 : vector<8x32xf32>
    %49 = arith.addf %47, %48 : vector<8x32xf32>
    %50 = vector.broadcast %c0_i32 : i32 to vector<8x1xi32>
    %51 = arith.cmpi slt, %50, %15 : vector<8x1xi32>
    %52 = vector.shape_cast %51 : vector<8x1xi1> to vector<8x1xi1>
    %53 = vector.broadcast %52 : vector<8x1xi1> to vector<8x32xi1>
    %54 = arith.select %53, %49, %16 : vector<8x32xi1>, vector<8x32xf32>
    %c1_i32 = arith.constant 1 : i32
    %c8_i32_25 = arith.constant 8 : i32
    %55 = arith.muli %c1_i32, %c8_i32_25 : i32
    %56 = tpu.assume_multiple %55, 8 : i32
    %57 = arith.index_cast %56 : i32 to index
    %c0_26 = arith.constant 0 : index
    %58 = vector.load %arg8[%57, %c0_26] : memref<64x96xf32, #tpu.memory_space<vmem>>, vector<8x96xf32>
    %cst_27 = arith.constant dense<0.000000e+00> : vector<8x96xf32>
    %59 = tpu.matmul %54, %11, %cst_27 {dimension_numbers = #tpu.dot_dimension_numbers<[1], [0], [0], [1], [0, 0, 1, 1], [], []>} : vector<8x32xf32>, vector<32x96xf32>, vector<8x96xf32> -> vector<8x96xf32>
    %60 = vector.extract_strided_slice %58 {offsets = [0, 0], sizes = [8, 32], strides = [1, 1]} : vector<8x96xf32> to vector<8x32xf32>
    %61 = vector.extract_strided_slice %59 {offsets = [0, 0], sizes = [8, 32], strides = [1, 1]} : vector<8x96xf32> to vector<8x32xf32>
    %62 = arith.addf %60, %61 : vector<8x32xf32>
    %63 = arith.negf %62 : vector<8x32xf32>
    %64 = math.exp %63 : vector<8x32xf32>
    %cst_28 = arith.constant 1.000000e+00 : f32
    %65 = vector.broadcast %cst_28 : f32 to vector<8x32xf32>
    %66 = arith.addf %65, %64 : vector<8x32xf32>
    %67 = arith.divf %65, %66 : vector<8x32xf32>
    %68 = vector.extract_strided_slice %58 {offsets = [0, 32], sizes = [8, 32], strides = [1, 1]} : vector<8x96xf32> to vector<8x32xf32>
    %69 = vector.extract_strided_slice %59 {offsets = [0, 32], sizes = [8, 32], strides = [1, 1]} : vector<8x96xf32> to vector<8x32xf32>
    %70 = arith.addf %68, %69 : vector<8x32xf32>
    %71 = arith.negf %70 : vector<8x32xf32>
    %72 = math.exp %71 : vector<8x32xf32>
    %cst_29 = arith.constant 1.000000e+00 : f32
    %73 = vector.broadcast %cst_29 : f32 to vector<8x32xf32>
    %74 = arith.addf %73, %72 : vector<8x32xf32>
    %75 = arith.divf %73, %74 : vector<8x32xf32>
    %76 = vector.extract_strided_slice %58 {offsets = [0, 64], sizes = [8, 32], strides = [1, 1]} : vector<8x96xf32> to vector<8x32xf32>
    %77 = vector.extract_strided_slice %59 {offsets = [0, 64], sizes = [8, 32], strides = [1, 1]} : vector<8x96xf32> to vector<8x32xf32>
    %78 = vector.broadcast %13 : vector<1x32xf32> to vector<8x32xf32>
    %79 = arith.addf %77, %78 : vector<8x32xf32>
    %80 = arith.mulf %67, %79 : vector<8x32xf32>
    %81 = arith.addf %76, %80 : vector<8x32xf32>
    %82 = math.tanh %81 : vector<8x32xf32>
    %cst_30 = arith.constant 1.000000e+00 : f32
    %83 = vector.broadcast %cst_30 : f32 to vector<8x32xf32>
    %84 = arith.subf %83, %75 : vector<8x32xf32>
    %85 = arith.mulf %84, %82 : vector<8x32xf32>
    %86 = arith.mulf %75, %54 : vector<8x32xf32>
    %87 = arith.addf %85, %86 : vector<8x32xf32>
    %88 = vector.broadcast %c1_i32 : i32 to vector<8x1xi32>
    %89 = arith.cmpi slt, %88, %15 : vector<8x1xi32>
    %90 = vector.shape_cast %89 : vector<8x1xi1> to vector<8x1xi1>
    %91 = vector.broadcast %90 : vector<8x1xi1> to vector<8x32xi1>
    %92 = arith.select %91, %87, %54 : vector<8x32xi1>, vector<8x32xf32>
    %c2_i32 = arith.constant 2 : i32
    %c8_i32_31 = arith.constant 8 : i32
    %93 = arith.muli %c2_i32, %c8_i32_31 : i32
    %94 = tpu.assume_multiple %93, 8 : i32
    %95 = arith.index_cast %94 : i32 to index
    %c0_32 = arith.constant 0 : index
    %96 = vector.load %arg8[%95, %c0_32] : memref<64x96xf32, #tpu.memory_space<vmem>>, vector<8x96xf32>
    %cst_33 = arith.constant dense<0.000000e+00> : vector<8x96xf32>
    %97 = tpu.matmul %92, %11, %cst_33 {dimension_numbers = #tpu.dot_dimension_numbers<[1], [0], [0], [1], [0, 0, 1, 1], [], []>} : vector<8x32xf32>, vector<32x96xf32>, vector<8x96xf32> -> vector<8x96xf32>
    %98 = vector.extract_strided_slice %96 {offsets = [0, 0], sizes = [8, 32], strides = [1, 1]} : vector<8x96xf32> to vector<8x32xf32>
    %99 = vector.extract_strided_slice %97 {offsets = [0, 0], sizes = [8, 32], strides = [1, 1]} : vector<8x96xf32> to vector<8x32xf32>
    %100 = arith.addf %98, %99 : vector<8x32xf32>
    %101 = arith.negf %100 : vector<8x32xf32>
    %102 = math.exp %101 : vector<8x32xf32>
    %cst_34 = arith.constant 1.000000e+00 : f32
    %103 = vector.broadcast %cst_34 : f32 to vector<8x32xf32>
    %104 = arith.addf %103, %102 : vector<8x32xf32>
    %105 = arith.divf %103, %104 : vector<8x32xf32>
    %106 = vector.extract_strided_slice %96 {offsets = [0, 32], sizes = [8, 32], strides = [1, 1]} : vector<8x96xf32> to vector<8x32xf32>
    %107 = vector.extract_strided_slice %97 {offsets = [0, 32], sizes = [8, 32], strides = [1, 1]} : vector<8x96xf32> to vector<8x32xf32>
    %108 = arith.addf %106, %107 : vector<8x32xf32>
    %109 = arith.negf %108 : vector<8x32xf32>
    %110 = math.exp %109 : vector<8x32xf32>
    %cst_35 = arith.constant 1.000000e+00 : f32
    %111 = vector.broadcast %cst_35 : f32 to vector<8x32xf32>
    %112 = arith.addf %111, %110 : vector<8x32xf32>
    %113 = arith.divf %111, %112 : vector<8x32xf32>
    %114 = vector.extract_strided_slice %96 {offsets = [0, 64], sizes = [8, 32], strides = [1, 1]} : vector<8x96xf32> to vector<8x32xf32>
    %115 = vector.extract_strided_slice %97 {offsets = [0, 64], sizes = [8, 32], strides = [1, 1]} : vector<8x96xf32> to vector<8x32xf32>
    %116 = vector.broadcast %13 : vector<1x32xf32> to vector<8x32xf32>
    %117 = arith.addf %115, %116 : vector<8x32xf32>
    %118 = arith.mulf %105, %117 : vector<8x32xf32>
    %119 = arith.addf %114, %118 : vector<8x32xf32>
    %120 = math.tanh %119 : vector<8x32xf32>
    %cst_36 = arith.constant 1.000000e+00 : f32
    %121 = vector.broadcast %cst_36 : f32 to vector<8x32xf32>
    %122 = arith.subf %121, %113 : vector<8x32xf32>
    %123 = arith.mulf %122, %120 : vector<8x32xf32>
    %124 = arith.mulf %113, %92 : vector<8x32xf32>
    %125 = arith.addf %123, %124 : vector<8x32xf32>
    %126 = vector.broadcast %c2_i32 : i32 to vector<8x1xi32>
    %127 = arith.cmpi slt, %126, %15 : vector<8x1xi32>
    %128 = vector.shape_cast %127 : vector<8x1xi1> to vector<8x1xi1>
    %129 = vector.broadcast %128 : vector<8x1xi1> to vector<8x32xi1>
    %130 = arith.select %129, %125, %92 : vector<8x32xi1>, vector<8x32xf32>
    %c3_i32 = arith.constant 3 : i32
    %c8_i32_37 = arith.constant 8 : i32
    %131 = arith.muli %c3_i32, %c8_i32_37 : i32
    %132 = tpu.assume_multiple %131, 8 : i32
    %133 = arith.index_cast %132 : i32 to index
    %c0_38 = arith.constant 0 : index
    %134 = vector.load %arg8[%133, %c0_38] : memref<64x96xf32, #tpu.memory_space<vmem>>, vector<8x96xf32>
    %cst_39 = arith.constant dense<0.000000e+00> : vector<8x96xf32>
    %135 = tpu.matmul %130, %11, %cst_39 {dimension_numbers = #tpu.dot_dimension_numbers<[1], [0], [0], [1], [0, 0, 1, 1], [], []>} : vector<8x32xf32>, vector<32x96xf32>, vector<8x96xf32> -> vector<8x96xf32>
    %136 = vector.extract_strided_slice %134 {offsets = [0, 0], sizes = [8, 32], strides = [1, 1]} : vector<8x96xf32> to vector<8x32xf32>
    %137 = vector.extract_strided_slice %135 {offsets = [0, 0], sizes = [8, 32], strides = [1, 1]} : vector<8x96xf32> to vector<8x32xf32>
    %138 = arith.addf %136, %137 : vector<8x32xf32>
    %139 = arith.negf %138 : vector<8x32xf32>
    %140 = math.exp %139 : vector<8x32xf32>
    %cst_40 = arith.constant 1.000000e+00 : f32
    %141 = vector.broadcast %cst_40 : f32 to vector<8x32xf32>
    %142 = arith.addf %141, %140 : vector<8x32xf32>
    %143 = arith.divf %141, %142 : vector<8x32xf32>
    %144 = vector.extract_strided_slice %134 {offsets = [0, 32], sizes = [8, 32], strides = [1, 1]} : vector<8x96xf32> to vector<8x32xf32>
    %145 = vector.extract_strided_slice %135 {offsets = [0, 32], sizes = [8, 32], strides = [1, 1]} : vector<8x96xf32> to vector<8x32xf32>
    %146 = arith.addf %144, %145 : vector<8x32xf32>
    %147 = arith.negf %146 : vector<8x32xf32>
    %148 = math.exp %147 : vector<8x32xf32>
    %cst_41 = arith.constant 1.000000e+00 : f32
    %149 = vector.broadcast %cst_41 : f32 to vector<8x32xf32>
    %150 = arith.addf %149, %148 : vector<8x32xf32>
    %151 = arith.divf %149, %150 : vector<8x32xf32>
    %152 = vector.extract_strided_slice %134 {offsets = [0, 64], sizes = [8, 32], strides = [1, 1]} : vector<8x96xf32> to vector<8x32xf32>
    %153 = vector.extract_strided_slice %135 {offsets = [0, 64], sizes = [8, 32], strides = [1, 1]} : vector<8x96xf32> to vector<8x32xf32>
    %154 = vector.broadcast %13 : vector<1x32xf32> to vector<8x32xf32>
    %155 = arith.addf %153, %154 : vector<8x32xf32>
    %156 = arith.mulf %143, %155 : vector<8x32xf32>
    %157 = arith.addf %152, %156 : vector<8x32xf32>
    %158 = math.tanh %157 : vector<8x32xf32>
    %cst_42 = arith.constant 1.000000e+00 : f32
    %159 = vector.broadcast %cst_42 : f32 to vector<8x32xf32>
    %160 = arith.subf %159, %151 : vector<8x32xf32>
    %161 = arith.mulf %160, %158 : vector<8x32xf32>
    %162 = arith.mulf %151, %130 : vector<8x32xf32>
    %163 = arith.addf %161, %162 : vector<8x32xf32>
    %164 = vector.broadcast %c3_i32 : i32 to vector<8x1xi32>
    %165 = arith.cmpi slt, %164, %15 : vector<8x1xi32>
    %166 = vector.shape_cast %165 : vector<8x1xi1> to vector<8x1xi1>
    %167 = vector.broadcast %166 : vector<8x1xi1> to vector<8x32xi1>
    %168 = arith.select %167, %163, %130 : vector<8x32xi1>, vector<8x32xf32>
    %c4_i32 = arith.constant 4 : i32
    %c8_i32_43 = arith.constant 8 : i32
    %169 = arith.muli %c4_i32, %c8_i32_43 : i32
    %170 = tpu.assume_multiple %169, 8 : i32
    %171 = arith.index_cast %170 : i32 to index
    %c0_44 = arith.constant 0 : index
    %172 = vector.load %arg8[%171, %c0_44] : memref<64x96xf32, #tpu.memory_space<vmem>>, vector<8x96xf32>
    %cst_45 = arith.constant dense<0.000000e+00> : vector<8x96xf32>
    %173 = tpu.matmul %168, %11, %cst_45 {dimension_numbers = #tpu.dot_dimension_numbers<[1], [0], [0], [1], [0, 0, 1, 1], [], []>} : vector<8x32xf32>, vector<32x96xf32>, vector<8x96xf32> -> vector<8x96xf32>
    %174 = vector.extract_strided_slice %172 {offsets = [0, 0], sizes = [8, 32], strides = [1, 1]} : vector<8x96xf32> to vector<8x32xf32>
    %175 = vector.extract_strided_slice %173 {offsets = [0, 0], sizes = [8, 32], strides = [1, 1]} : vector<8x96xf32> to vector<8x32xf32>
    %176 = arith.addf %174, %175 : vector<8x32xf32>
    %177 = arith.negf %176 : vector<8x32xf32>
    %178 = math.exp %177 : vector<8x32xf32>
    %cst_46 = arith.constant 1.000000e+00 : f32
    %179 = vector.broadcast %cst_46 : f32 to vector<8x32xf32>
    %180 = arith.addf %179, %178 : vector<8x32xf32>
    %181 = arith.divf %179, %180 : vector<8x32xf32>
    %182 = vector.extract_strided_slice %172 {offsets = [0, 32], sizes = [8, 32], strides = [1, 1]} : vector<8x96xf32> to vector<8x32xf32>
    %183 = vector.extract_strided_slice %173 {offsets = [0, 32], sizes = [8, 32], strides = [1, 1]} : vector<8x96xf32> to vector<8x32xf32>
    %184 = arith.addf %182, %183 : vector<8x32xf32>
    %185 = arith.negf %184 : vector<8x32xf32>
    %186 = math.exp %185 : vector<8x32xf32>
    %cst_47 = arith.constant 1.000000e+00 : f32
    %187 = vector.broadcast %cst_47 : f32 to vector<8x32xf32>
    %188 = arith.addf %187, %186 : vector<8x32xf32>
    %189 = arith.divf %187, %188 : vector<8x32xf32>
    %190 = vector.extract_strided_slice %172 {offsets = [0, 64], sizes = [8, 32], strides = [1, 1]} : vector<8x96xf32> to vector<8x32xf32>
    %191 = vector.extract_strided_slice %173 {offsets = [0, 64], sizes = [8, 32], strides = [1, 1]} : vector<8x96xf32> to vector<8x32xf32>
    %192 = vector.broadcast %13 : vector<1x32xf32> to vector<8x32xf32>
    %193 = arith.addf %191, %192 : vector<8x32xf32>
    %194 = arith.mulf %181, %193 : vector<8x32xf32>
    %195 = arith.addf %190, %194 : vector<8x32xf32>
    %196 = math.tanh %195 : vector<8x32xf32>
    %cst_48 = arith.constant 1.000000e+00 : f32
    %197 = vector.broadcast %cst_48 : f32 to vector<8x32xf32>
    %198 = arith.subf %197, %189 : vector<8x32xf32>
    %199 = arith.mulf %198, %196 : vector<8x32xf32>
    %200 = arith.mulf %189, %168 : vector<8x32xf32>
    %201 = arith.addf %199, %200 : vector<8x32xf32>
    %202 = vector.broadcast %c4_i32 : i32 to vector<8x1xi32>
    %203 = arith.cmpi slt, %202, %15 : vector<8x1xi32>
    %204 = vector.shape_cast %203 : vector<8x1xi1> to vector<8x1xi1>
    %205 = vector.broadcast %204 : vector<8x1xi1> to vector<8x32xi1>
    %206 = arith.select %205, %201, %168 : vector<8x32xi1>, vector<8x32xf32>
    %c5_i32 = arith.constant 5 : i32
    %c8_i32_49 = arith.constant 8 : i32
    %207 = arith.muli %c5_i32, %c8_i32_49 : i32
    %208 = tpu.assume_multiple %207, 8 : i32
    %209 = arith.index_cast %208 : i32 to index
    %c0_50 = arith.constant 0 : index
    %210 = vector.load %arg8[%209, %c0_50] : memref<64x96xf32, #tpu.memory_space<vmem>>, vector<8x96xf32>
    %cst_51 = arith.constant dense<0.000000e+00> : vector<8x96xf32>
    %211 = tpu.matmul %206, %11, %cst_51 {dimension_numbers = #tpu.dot_dimension_numbers<[1], [0], [0], [1], [0, 0, 1, 1], [], []>} : vector<8x32xf32>, vector<32x96xf32>, vector<8x96xf32> -> vector<8x96xf32>
    %212 = vector.extract_strided_slice %210 {offsets = [0, 0], sizes = [8, 32], strides = [1, 1]} : vector<8x96xf32> to vector<8x32xf32>
    %213 = vector.extract_strided_slice %211 {offsets = [0, 0], sizes = [8, 32], strides = [1, 1]} : vector<8x96xf32> to vector<8x32xf32>
    %214 = arith.addf %212, %213 : vector<8x32xf32>
    %215 = arith.negf %214 : vector<8x32xf32>
    %216 = math.exp %215 : vector<8x32xf32>
    %cst_52 = arith.constant 1.000000e+00 : f32
    %217 = vector.broadcast %cst_52 : f32 to vector<8x32xf32>
    %218 = arith.addf %217, %216 : vector<8x32xf32>
    %219 = arith.divf %217, %218 : vector<8x32xf32>
    %220 = vector.extract_strided_slice %210 {offsets = [0, 32], sizes = [8, 32], strides = [1, 1]} : vector<8x96xf32> to vector<8x32xf32>
    %221 = vector.extract_strided_slice %211 {offsets = [0, 32], sizes = [8, 32], strides = [1, 1]} : vector<8x96xf32> to vector<8x32xf32>
    %222 = arith.addf %220, %221 : vector<8x32xf32>
    %223 = arith.negf %222 : vector<8x32xf32>
    %224 = math.exp %223 : vector<8x32xf32>
    %cst_53 = arith.constant 1.000000e+00 : f32
    %225 = vector.broadcast %cst_53 : f32 to vector<8x32xf32>
    %226 = arith.addf %225, %224 : vector<8x32xf32>
    %227 = arith.divf %225, %226 : vector<8x32xf32>
    %228 = vector.extract_strided_slice %210 {offsets = [0, 64], sizes = [8, 32], strides = [1, 1]} : vector<8x96xf32> to vector<8x32xf32>
    %229 = vector.extract_strided_slice %211 {offsets = [0, 64], sizes = [8, 32], strides = [1, 1]} : vector<8x96xf32> to vector<8x32xf32>
    %230 = vector.broadcast %13 : vector<1x32xf32> to vector<8x32xf32>
    %231 = arith.addf %229, %230 : vector<8x32xf32>
    %232 = arith.mulf %219, %231 : vector<8x32xf32>
    %233 = arith.addf %228, %232 : vector<8x32xf32>
    %234 = math.tanh %233 : vector<8x32xf32>
    %cst_54 = arith.constant 1.000000e+00 : f32
    %235 = vector.broadcast %cst_54 : f32 to vector<8x32xf32>
    %236 = arith.subf %235, %227 : vector<8x32xf32>
    %237 = arith.mulf %236, %234 : vector<8x32xf32>
    %238 = arith.mulf %227, %206 : vector<8x32xf32>
    %239 = arith.addf %237, %238 : vector<8x32xf32>
    %240 = vector.broadcast %c5_i32 : i32 to vector<8x1xi32>
    %241 = arith.cmpi slt, %240, %15 : vector<8x1xi32>
    %242 = vector.shape_cast %241 : vector<8x1xi1> to vector<8x1xi1>
    %243 = vector.broadcast %242 : vector<8x1xi1> to vector<8x32xi1>
    %244 = arith.select %243, %239, %206 : vector<8x32xi1>, vector<8x32xf32>
    %c6_i32 = arith.constant 6 : i32
    %c8_i32_55 = arith.constant 8 : i32
    %245 = arith.muli %c6_i32, %c8_i32_55 : i32
    %246 = tpu.assume_multiple %245, 8 : i32
    %247 = arith.index_cast %246 : i32 to index
    %c0_56 = arith.constant 0 : index
    %248 = vector.load %arg8[%247, %c0_56] : memref<64x96xf32, #tpu.memory_space<vmem>>, vector<8x96xf32>
    %cst_57 = arith.constant dense<0.000000e+00> : vector<8x96xf32>
    %249 = tpu.matmul %244, %11, %cst_57 {dimension_numbers = #tpu.dot_dimension_numbers<[1], [0], [0], [1], [0, 0, 1, 1], [], []>} : vector<8x32xf32>, vector<32x96xf32>, vector<8x96xf32> -> vector<8x96xf32>
    %250 = vector.extract_strided_slice %248 {offsets = [0, 0], sizes = [8, 32], strides = [1, 1]} : vector<8x96xf32> to vector<8x32xf32>
    %251 = vector.extract_strided_slice %249 {offsets = [0, 0], sizes = [8, 32], strides = [1, 1]} : vector<8x96xf32> to vector<8x32xf32>
    %252 = arith.addf %250, %251 : vector<8x32xf32>
    %253 = arith.negf %252 : vector<8x32xf32>
    %254 = math.exp %253 : vector<8x32xf32>
    %cst_58 = arith.constant 1.000000e+00 : f32
    %255 = vector.broadcast %cst_58 : f32 to vector<8x32xf32>
    %256 = arith.addf %255, %254 : vector<8x32xf32>
    %257 = arith.divf %255, %256 : vector<8x32xf32>
    %258 = vector.extract_strided_slice %248 {offsets = [0, 32], sizes = [8, 32], strides = [1, 1]} : vector<8x96xf32> to vector<8x32xf32>
    %259 = vector.extract_strided_slice %249 {offsets = [0, 32], sizes = [8, 32], strides = [1, 1]} : vector<8x96xf32> to vector<8x32xf32>
    %260 = arith.addf %258, %259 : vector<8x32xf32>
    %261 = arith.negf %260 : vector<8x32xf32>
    %262 = math.exp %261 : vector<8x32xf32>
    %cst_59 = arith.constant 1.000000e+00 : f32
    %263 = vector.broadcast %cst_59 : f32 to vector<8x32xf32>
    %264 = arith.addf %263, %262 : vector<8x32xf32>
    %265 = arith.divf %263, %264 : vector<8x32xf32>
    %266 = vector.extract_strided_slice %248 {offsets = [0, 64], sizes = [8, 32], strides = [1, 1]} : vector<8x96xf32> to vector<8x32xf32>
    %267 = vector.extract_strided_slice %249 {offsets = [0, 64], sizes = [8, 32], strides = [1, 1]} : vector<8x96xf32> to vector<8x32xf32>
    %268 = vector.broadcast %13 : vector<1x32xf32> to vector<8x32xf32>
    %269 = arith.addf %267, %268 : vector<8x32xf32>
    %270 = arith.mulf %257, %269 : vector<8x32xf32>
    %271 = arith.addf %266, %270 : vector<8x32xf32>
    %272 = math.tanh %271 : vector<8x32xf32>
    %cst_60 = arith.constant 1.000000e+00 : f32
    %273 = vector.broadcast %cst_60 : f32 to vector<8x32xf32>
    %274 = arith.subf %273, %265 : vector<8x32xf32>
    %275 = arith.mulf %274, %272 : vector<8x32xf32>
    %276 = arith.mulf %265, %244 : vector<8x32xf32>
    %277 = arith.addf %275, %276 : vector<8x32xf32>
    %278 = vector.broadcast %c6_i32 : i32 to vector<8x1xi32>
    %279 = arith.cmpi slt, %278, %15 : vector<8x1xi32>
    %280 = vector.shape_cast %279 : vector<8x1xi1> to vector<8x1xi1>
    %281 = vector.broadcast %280 : vector<8x1xi1> to vector<8x32xi1>
    %282 = arith.select %281, %277, %244 : vector<8x32xi1>, vector<8x32xf32>
    %c7_i32 = arith.constant 7 : i32
    %c8_i32_61 = arith.constant 8 : i32
    %283 = arith.muli %c7_i32, %c8_i32_61 : i32
    %284 = tpu.assume_multiple %283, 8 : i32
    %285 = arith.index_cast %284 : i32 to index
    %c0_62 = arith.constant 0 : index
    %286 = vector.load %arg8[%285, %c0_62] : memref<64x96xf32, #tpu.memory_space<vmem>>, vector<8x96xf32>
    %cst_63 = arith.constant dense<0.000000e+00> : vector<8x96xf32>
    %287 = tpu.matmul %282, %11, %cst_63 {dimension_numbers = #tpu.dot_dimension_numbers<[1], [0], [0], [1], [0, 0, 1, 1], [], []>} : vector<8x32xf32>, vector<32x96xf32>, vector<8x96xf32> -> vector<8x96xf32>
    %288 = vector.extract_strided_slice %286 {offsets = [0, 0], sizes = [8, 32], strides = [1, 1]} : vector<8x96xf32> to vector<8x32xf32>
    %289 = vector.extract_strided_slice %287 {offsets = [0, 0], sizes = [8, 32], strides = [1, 1]} : vector<8x96xf32> to vector<8x32xf32>
    %290 = arith.addf %288, %289 : vector<8x32xf32>
    %291 = arith.negf %290 : vector<8x32xf32>
    %292 = math.exp %291 : vector<8x32xf32>
    %cst_64 = arith.constant 1.000000e+00 : f32
    %293 = vector.broadcast %cst_64 : f32 to vector<8x32xf32>
    %294 = arith.addf %293, %292 : vector<8x32xf32>
    %295 = arith.divf %293, %294 : vector<8x32xf32>
    %296 = vector.extract_strided_slice %286 {offsets = [0, 32], sizes = [8, 32], strides = [1, 1]} : vector<8x96xf32> to vector<8x32xf32>
    %297 = vector.extract_strided_slice %287 {offsets = [0, 32], sizes = [8, 32], strides = [1, 1]} : vector<8x96xf32> to vector<8x32xf32>
    %298 = arith.addf %296, %297 : vector<8x32xf32>
    %299 = arith.negf %298 : vector<8x32xf32>
    %300 = math.exp %299 : vector<8x32xf32>
    %cst_65 = arith.constant 1.000000e+00 : f32
    %301 = vector.broadcast %cst_65 : f32 to vector<8x32xf32>
    %302 = arith.addf %301, %300 : vector<8x32xf32>
    %303 = arith.divf %301, %302 : vector<8x32xf32>
    %304 = vector.extract_strided_slice %286 {offsets = [0, 64], sizes = [8, 32], strides = [1, 1]} : vector<8x96xf32> to vector<8x32xf32>
    %305 = vector.extract_strided_slice %287 {offsets = [0, 64], sizes = [8, 32], strides = [1, 1]} : vector<8x96xf32> to vector<8x32xf32>
    %306 = vector.broadcast %13 : vector<1x32xf32> to vector<8x32xf32>
    %307 = arith.addf %305, %306 : vector<8x32xf32>
    %308 = arith.mulf %295, %307 : vector<8x32xf32>
    %309 = arith.addf %304, %308 : vector<8x32xf32>
    %310 = math.tanh %309 : vector<8x32xf32>
    %cst_66 = arith.constant 1.000000e+00 : f32
    %311 = vector.broadcast %cst_66 : f32 to vector<8x32xf32>
    %312 = arith.subf %311, %303 : vector<8x32xf32>
    %313 = arith.mulf %312, %310 : vector<8x32xf32>
    %314 = arith.mulf %303, %282 : vector<8x32xf32>
    %315 = arith.addf %313, %314 : vector<8x32xf32>
    %316 = vector.broadcast %c7_i32 : i32 to vector<8x1xi32>
    %317 = arith.cmpi slt, %316, %15 : vector<8x1xi32>
    %318 = vector.shape_cast %317 : vector<8x1xi1> to vector<8x1xi1>
    %319 = vector.broadcast %318 : vector<8x1xi1> to vector<8x32xi1>
    %320 = arith.select %319, %315, %282 : vector<8x32xi1>, vector<8x32xf32>
    %c8_i32_67 = arith.constant 8 : i32
    %c0_68 = arith.constant 0 : index
    %c0_69 = arith.constant 0 : index
    %c0_70 = arith.constant 0 : index
    %321 = vector.load %arg7[%c0_68, %c0_69, %c0_70] : memref<1x8x32xf32, #tpu.memory_space<vmem>>, vector<1x8x32xf32>
    %322 = vector.shape_cast %321 : vector<1x8x32xf32> to vector<8x32xf32>
    %323 = vector.shape_cast %320 : vector<8x32xf32> to vector<1x8x32xf32>
    tpu.vector_store %arg7[%c0_68, %c0_69, %c0_70], %323 {strides = array<i32>} : memref<1x8x32xf32, #tpu.memory_space<vmem>>, vector<1x8x32xf32>,
    return
  }
  func.func @transform_0(%arg0: i32) -> (i32, i32, i32) {
    %c0_i32 = arith.constant 0 : i32
    %c0_i32_0 = arith.constant 0 : i32
    %c0_i32_1 = arith.constant 0 : i32
    return %arg0, %c0_i32, %c0_i32_0 : i32, i32, i32
  }
  func.func @transform_1(%arg0: i32) -> (i32, i32, i32) {
    %c0_i32 = arith.constant 0 : i32
    %c0_i32_0 = arith.constant 0 : i32
    %c0_i32_1 = arith.constant 0 : i32
    return %arg0, %c0_i32, %c0_i32_0 : i32, i32, i32
  }
  func.func @transform_2(%arg0: i32) -> (i32, i32, i32) {
    %c0_i32 = arith.constant 0 : i32
    %c0_i32_0 = arith.constant 0 : i32
    %c0_i32_1 = arith.constant 0 : i32
    return %arg0, %c0_i32, %c0_i32_0 : i32, i32, i32
  }
  func.func @transform_3(%arg0: i32) -> (i32, i32, i32) {
    %c0_i32 = arith.constant 0 : i32
    %c0_i32_0 = arith.constant 0 : i32
    %c0_i32_1 = arith.constant 0 : i32
    return %arg0, %c0_i32, %c0_i32_0 : i32, i32, i32
  }
  func.func @transform_4(%arg0: i32) -> (i32, i32, i32) {
    %c0_i32 = arith.constant 0 : i32
    %c0_i32_0 = arith.constant 0 : i32
    %c0_i32_1 = arith.constant 0 : i32
    return %arg0, %c0_i32, %c0_i32_0 : i32, i32, i32
  }
  func.func @transform_5(%arg0: i32) -> (i32, i32, i32) {
    %c0_i32 = arith.constant 0 : i32
    %c0_i32_0 = arith.constant 0 : i32
    %c0_i32_1 = arith.constant 0 : i32
    return %arg0, %c0_i32, %c0_i32_0 : i32, i32, i32
  }
  func.func @transform_6(%arg0: i32) -> (i32, i32, i32) {
    %c0_i32 = arith.constant 0 : i32
    %c0_i32_0 = arith.constant 0 : i32
    %c0_i32_1 = arith.constant 0 : i32
    return %arg0, %c0_i32, %c0_i32_0 : i32, i32, i32
  }
}

</mosaic_0001>

<bundles_post_ra>
// kernel: tpu_custom_call.1
= control target key start
LH: loop header
LB: loop body
LE: loop exit
PB: predicated region body
PF: predicated region fallthrough
CT: control target
= control target key end

     0   :  { %11 = vsyncpa [#allocation4], 0  ;;  %s1668_s0 = inlined_call_operand.vmem [shape: f32[4,64,16], index: 0, kind: input, shape index: {}]   ;;  %s1669_s1 = inlined_call_operand.vmem [shape: s32[4,8,1], index: 1, kind: input, shape index: {}]   ;;  %s1670_s2 = inlined_call_operand.vmem [shape: f32[4,16,96], index: 2, kind: input, shape index: {}]   ;;  %s1671_s3 = inlined_call_operand.vmem [shape: f32[4,32,96], index: 3, kind: input, shape index: {}]   ;;  %s1672_s4 = inlined_call_operand.vmem [shape: f32[4,1,96], index: 4, kind: input, shape index: {}]   ;;  %s1673_s5 = inlined_call_operand.vmem [shape: f32[4,1,32], index: 5, kind: input, shape index: {}]   ;;  %s1674_s6 = inlined_call_operand.hbm [shape: f32[4,8,32], index: 6, kind: output, shape index: {}]  }
   0x1   :  { %13 = vsyncpa [#allocation4 + $0x1], 0  ;;  %s1402_s21 = smov 0   ;;  %s1404_s22 = smov 0  }
   0x2   :  { %s1406_s23 = smov 0   ;;  %s1408_s24 = smov 0  }
   0x3 LB: > { %s1423_s25 = sadd.s32 4294967295, %s1361_s24   ;;  %s1159_s26 = sadd.s32 4294967294, %s1361_s24   ;;  %s1361_s24 = sphi %s1408_s24, %s1680_s24   ;;  %s1357_s23 = sphi %s1406_s23, %s1679_s23   ;;  %s1353_s22 = sphi %s1404_s22, %s1678_s22   ;;  %s1349_s21 = sphi %s1402_s21, %s1677_s21  }
   0x4   : > { %s1427_s27 = sadd.s32 1, %s1361_s24   ;;  %s182_s28 = sadd.s32 1, %s1357_s23 }
   0x5   : > { %s179_s29 = ssub.s32 %s1361_s24, %s1427_s27  ;;  %p192_p0 = scmp.ne.s32.totalorder %s1357_s23, %s1353_s22 }
   0x6   : > { %p180_p1 = scmp.eq.s32.totalorder %s179_s29, 0  ;;  %p193_p2 = scmp.eq.s32.totalorder %s1423_s25, 3 }
   0x7   : > { %p198_p3 = scmp.ne.s32.totalorder %s1353_s22, %s1349_s21  ;;  %p199_p4 = scmp.eq.s32.totalorder %s1159_s26, 3 }
   0x8   : > { %s1438_s30 = scalar_select %p180_p1, %s1357_s23, %s182_s28  }
   0x9   : > { %p1440_p5 = por %p193_p2, %p192_p0  ;;  %p1444_p6 = por %p199_p4, %p198_p3 }
   0xa   : > { %p1162_p7 = scmp.ge.s32.totalorder %s1361_s24, 1  ;;  %p260_p8 = scmp.lt.s32.totalorder %s1361_s24, 5 }
   0xc   : > { %p261_p9 = pnand %p1162_p7, %p260_p8 }
   0xd   : > { %p310_p10 = scmp.lt.s32.totalorder (!%p261_p9), %s1423_s25, 3  ;;  %s1195_s29 = sshll.u32 (!%p261_p9), %s1423_s25, 3 }
   0xe   : > { %264 = sbr.rel (%p261_p9) target bundleno = 4632 (0x1218), region = 44  ;;  %s1041_s12 = scalar_lea.hbm (!%p261_p9), %s1674_s6, %s1195_s29 }
   0xf   : > { %s1045_s15 = sshll.u32 (!%p261_p9), %s1041_s12, 4  ;;  %s1046_s15 = int_to_ptr.hbm [resolvable:$true] %s1045_s15 }
  0x13   : > { %s1452_s9 = scalar_select %p310_p10, %s1423_s25, 3  ;;  %vm349_vm0 = vcmask 130048   ;;  %v1364_v8 = vmov 0.0   ;;  %vm415_vm1 = vcmask 785408   ;;  %v1365_v33 = vmov 0  }
  0x14   : > { %1246 = vset.pattern.permute.xlu2 %v1365_v33  ;;  %1247 = vset.pattern.permute.xlu0 %v1365_v33  ;;  %vm431_vm8 = vcmask 261120  }
  0x15   : > { %s1199_s10 = sshll.u32 %s1452_s9, 4  ;;  %s1200_s11 = sshll.u32 %s1452_s9, 5  ;;  %1248 = vset.pattern.permute.xlu1 %v1365_v33 }
  0x16   : > { %s323_s14 = scalar_lea.vmem %s1670_s2, %s1199_s10  ;;  %s328_s17 = scalar_lea.vmem %s1671_s3, %s1200_s11 }
  0x17   : > { %v344_v0 = vld [vmem:[%s323_s14 + $0x8] sm:$0xff]  ;;  %v1462_v1 = vld [vmem:[%s328_s17 + $0x18] sm:$0xff]  ;;  %v343_v2 = vld [vmem:[%s323_s14] sm:$0xff]  ;;  %s1198_s18 = sshll.u32 %s1452_s9, 6  ;;  %s334_s26 = scalar_lea.vmem %s1673_s5, %s1452_s9 }
  0x18   : > { %388 = vmatpush.msra.mxu0 %v344_v0  ;;  %447 = vmatpush.msra.mxu1 %v1462_v1  ;;  %v1470_v3 = vld [vmem:[%s328_s17 + $0x10] sm:$0xff]  ;;  %s1475_s10 = scalar_lea.vmem %s1668_s0, %s1198_s18  ;;  %v1477_v4 = vld [vmem:[%s328_s17 + $0x8] sm:$0xff]  ;;  %v1249_v6 = vld [vmem:[%s334_s26] ss:$0 sm:$0xff]  ;;  %s331_s13 = scalar_lea.vmem %s1672_s4, %s1452_s9 }
  0x19   : > { %v335_v5 = vld [vmem:[%s1475_s10] sm:$0xff]  ;;  %526 = vmatpush.msra.mxu2 %v1462_v1  ;;  %1201 = vmatpush.msra.mxu3 %v344_v0  ;;  %s1363_s14 = smov 64   ;;  %v336_v38 = vld [vmem:[%s1475_s10 + $0x8] sm:$0xff]  ;;  %s307_s26 = sand.u32 1, %s1353_s22  }
  0x1a   : > { %389 = vmatpush.msra.mxu0 %v343_v2  ;;  %448 = vmatpush.msra.mxu1 %v1470_v3  ;;  %v1487_v7 = vld [vmem:[%s328_s17] sm:$0xff]  ;;  %s1166_s17 = sshll.u32 %s1452_s9, 3  ;;  %s1366_s9 = smov 96  }
  0x1b   : > { %1171 = vmatmul.msk.f32.vlgmr.msra.gmra.mxu0 %vm349_vm0, %v335_v5  ;;  %477 = vrot.lane.b32.xlu0 %v1249_v6, %s1363_s14  ;;  %v1516_v9 = vld [vmem:[%s331_s13] ss:$0 sm:$0xff]  ;;  %s318_s20 = scalar_lea.vmem %s1669_s1, %s1166_s17  ;;  %s1163_s28 = sshll.u32 %s307_s26, 3 }
  0x1c   : > { %449 = vmatpush.msra.mxu1 %v1477_v4  ;;  %527 = vmatpush.msra.mxu2 %v1470_v3  ;;  %v1529_v32 = vld [vmem:[%s318_s20] sm:$0xff]  ;;  %s309_s13 = scalar_lea.vmem [#allocation3], %s1163_s28  ;;  %s1031_s16 = scalar_lea.sflag [#allocation4], %s307_s26 }
  0x1d   : > { %1202 = vmatpush.msra.mxu3 %v343_v2  ;;  %vm500_vm6 = vcmp.gt.s32.totalorder %v1529_v32, 0  ;;  %vm574_vm9 = vcmp.gt.s32.totalorder %v1529_v32, 1  ;;  %vm648_vm10 = vcmp.gt.s32.totalorder %v1529_v32, 2  ;;  %s1313_s17 = sshra.s32 %s1046_s15, 4  ;;  %s1319_s20 = scalar_lea.hbm %s1674_s6, 32  ;;  %s1314_s17 = int_to_ptr.hbm [resolvable:$true] %s1313_s17 }
  0x1e   : > { %450 = vmatpush.msra.mxu1 %v1487_v7  ;;  %528 = vmatpush.msra.mxu2 %v1477_v4  ;;  %v501_v34 = vsel %vm500_vm6, 1, %v1365_v33  ;;  %v575_v56 = vsel %vm574_vm9, 1, %v1365_v33  ;;  %v649_v58 = vsel %vm648_vm10, 1, %v1365_v33  ;;  %s1315_s18 = scalar_lea.hbm %s1314_s17, 8  ;;  %p1320_p0 = scmp.lt.s32.totalorder %s1314_s17, %s1674_s6 }
  0x1f   : > { %451 = vmatmul.f32.vlgmr.msra.gmra.mxu1 %v1364_v8  ;;  %600 = vmatpush.msrb.mxu3 %v1462_v1  ;;  %p1316_p11 = scmp.ne.s32.totalorder %s1314_s17, %s1315_s18  ;;  %p1321_p1 = scmp.lt.s32.totalorder %s1319_s20, %s1315_s18 }
  0x20   : > { %529 = vmatpush.msra.mxu2 %v1487_v7  ;;  %674 = vmatpush.msrb.mxu1 %v1462_v1 }
  0x21   : > { %601 = vmatpush.msrb.mxu3 %v1470_v3  ;;  %503 = vperm.xlu2 %1246, %v501_v34   ;;  %p1317_p12 = pnand %p1316_p11, %p1440_p5  ;;  %p1322_p2 = por %p1321_p1, %p1320_p0 }
  0x22   : > { %748 = vmatpush.msrb.mxu2 %v1462_v1  ;;  %675 = vmatpush.msrb.mxu1 %v1470_v3 }
  0x23   : > { %602 = vmatpush.msrb.mxu3 %v1477_v4  ;;  %1172 = vmatmul.msk.f32.gmra.mxu0 %vm349_vm0, %v336_v38  ;;  %p1318_p13 = pneg %p1317_p12 }
  0x24   : > { %749 = vmatpush.msrb.mxu2 %v1470_v3  ;;  %676 = vmatpush.msrb.mxu1 %v1477_v4 }
  0x25   : > { %603 = vmatpush.msrb.mxu3 %v1487_v7  ;;  %p1323_p3 = pnand %p1322_p2, %p1318_p13 }
  0x26   : > { %750 = vmatpush.msrb.mxu2 %v1477_v4  ;;  %677 = vmatpush.msrb.mxu1 %v1487_v7 }
  0x28   : > { %751 = vmatpush.msrb.mxu2 %v1487_v7  ;;  %896 = vmatpush.msra.mxu1 %v1462_v1 }
  0x2a   : > { %897 = vmatpush.msra.mxu1 %v1470_v3 }
  0x2c   : > { %898 = vmatpush.msra.mxu1 %v1477_v4 }
  0x2e   : > { %899 = vmatpush.msra.mxu1 %v1487_v7 }
  0x7b   : > { %v504_v40 = vpop.permute.xlu2 %503 }
  0x7c   : > { %vm505_vm7 = vcmp.eq.s32.totalorder %v504_v40, 1 }
  0x8d   : > { %v1519_v12 = vpop.permute.xlu0 %477 }
  0x98   : > { %v391_v10 = vpop.f32.mrf.mxu0 }
  0x99   : > { %v392_v11 = vadd.f32 %v1516_v9, %v391_v10 }
  0x9b   : > { %416 = vst.msk [vmem:[#allocation2] sm:$0xff] %vm415_vm1, %v392_v11 }
  0x9c   : > { %v452_v13 = vpop.f32.mrf.mxu1 }
  0x9d   : > { %v480_v14 = vadd.f32 %v1519_v12, %v452_v13 }
  0x9f   : > { %482 = vrot.lane.b32.xlu0 %v480_v14, %s1363_s14 }
  0xa0   : > { %v394_v47 = vpop.f32.mrf.mxu0 }
  0xa1   : > { %v395_v48 = vadd.f32 %v1516_v9, %v394_v47 }
  0xa2   : > { %v430_v15 = vld [vmem:[#allocation2] sm:$0xff] }
  0xa3   : > { %v455_v16 = vadd.f32 %v452_v13, %v430_v15  ;;  %417 = vst.msk [vmem:[#allocation2 + $0x8] sm:$0xff] %vm415_vm1, %v395_v48 }
  0xa5   : > { %v1179_v17 = vmul.f32 -1.442695, %v455_v16  ;;  %v337_v16 = vld [vmem:[%s1475_s10 + $0x10] sm:$0xff] }
  0xa6   : > { %1173 = vmatmul.msk.f32.gmra.mxu0 %vm349_vm0, %v337_v16 }
  0xa7   : > { %1251 = vpow2.f32 %v1179_v17  ;;  %v341_v17 = vld [vmem:[%s1475_s10 + $0x30] sm:$0xff] }
  0xaa   : > { %v508_v51 = vld [vmem:[#allocation2 + $0x8] sm:$0xff] }
  0xad   : > { %v1252_v18 = vpop.eup %1251 }
  0xae   : > { %v459_v19 = vadd.f32 1.0, %v1252_v18  ;;  %v342_v18 = vld [vmem:[%s1475_s10 + $0x38] sm:$0xff] }
  0xb0   : > { %1253 = vrcp.f32 %v459_v19  ;;  %v471_v25 = vand.u32 2147483648, %v459_v19  ;;  %vm465_vm3 = vweird.f32 %v459_v19  ;;  %v469_v26 = vand.u32 2147483647, %v459_v19 }
  0xb2   : > { %v472_v28 = vor.u32 1.1754944e-38, %v471_v25  ;;  %vm470_vm5 = vcmp.eq.f32.partialorder %v469_v26, 8.507059e+37 }
  0xb6   : > { %v1254_v20 = vpop.eup %1253 }
  0xb7   : > { %v461_v21 = vmul.f32 %v1254_v20, %v459_v19  ;;  %vm466_vm2 = vweird.f32 %v1254_v20 }
  0xb8   : > { %vm467_vm4 = vmor %vm465_vm3, %vm466_vm2 }
  0xb9   : > { %v462_v22 = vsub.f32 1.0, %v461_v21 }
  0xbb   : > { %v463_v23 = vmul.f32 %v1254_v20, %v462_v22 }
  0xbd   : > { %v464_v24 = vadd.f32 %v1254_v20, %v463_v23 }
  0xbf   : > { %v468_v27 = vsel %vm467_vm4, %v1254_v20, %v464_v24 }
  0xc0   : > { %v473_v30 = vsel %vm470_vm5, %v472_v28, %v468_v27 }
  0xc1   : > { %v492_v39 = vsub.f32 1.0, %v473_v30  ;;  %v498_v42 = vmul.f32 0.0, %v473_v30 }
 0x111   : > { %v483_v29 = vpop.permute.xlu0 %482 }
 0x112   : > { %v485_v31 = vmul.f32 %v483_v29, %v473_v30 }
 0x114   : > { %487 = vrot.lane.b32.xlu1 %v485_v31, %s1363_s14 }
 0x186   : > { %v488_v35 = vpop.permute.xlu1 %487 }
 0x187   : > { %v490_v36 = vadd.f32 %v488_v35, %v430_v15  ;;  %v340_v15 = vld [vmem:[%s1475_s10 + $0x28] sm:$0xff] }
 0x188   : > { %1176 = vmatmul.msk.f32.vlgmr.msra.gmra.mxu3 %vm349_vm0, %v340_v15 }
 0x189   : > { %1255 = vtanh.f32 %v490_v36  ;;  %822 = vmatpush.msra.mxu3 %v1462_v1 }
 0x18b   : > { %823 = vmatpush.msra.mxu3 %v1470_v3 }
 0x18d   : > { %824 = vmatpush.msra.mxu3 %v1477_v4 }
 0x18f   : > { %v1256_v37 = vpop.eup %1255  ;;  %825 = vmatpush.msra.mxu3 %v1487_v7 }
 0x190   : > { %494 = vrot.lane.b32.xlu1 %v1256_v37, %s1366_s9  ;;  %1177 = vmatmul.msk.f32.gmra.mxu3 %vm349_vm0, %v341_v17 }
 0x198   : > { %1178 = vmatmul.msk.f32.gmra.mxu3 %vm349_vm0, %v342_v18 }
 0x202   : > { %v495_v41 = vpop.permute.xlu1 %494 }
 0x203   : > { %v497_v43 = vmul.f32 %v495_v41, %v492_v39 }
 0x205   : > { %v499_v44 = vadd.f32 %v498_v42, %v497_v43 }
 0x207   : > { %v1539_v45 = vsel %vm505_vm7, %v499_v44, 0.0  ;;  %vm722_vm7 = vcmp.gt.s32.totalorder %v1529_v32, 3 }
 0x208   : > { %510 = vrot.lane.b32.xlu2 %v1539_v45, %s1366_s9 }
 0x20b   : > { %v406_v24 = vpop.f32.mrf.mxu3 }
 0x20c   : > { %v407_v25 = vadd.f32 %v1516_v9, %v406_v24 }
 0x20e   : > { %421 = vst.msk [vmem:[#allocation2 + $0x28] sm:$0xff] %vm415_vm1, %v407_v25 }
 0x213   : > { %v409_v26 = vpop.f32.mrf.mxu3 }
 0x214   : > { %v410_v27 = vadd.f32 %v1516_v9, %v409_v26 }
 0x216   : > { %422 = vst.msk [vmem:[#allocation2 + $0x30] sm:$0xff] %vm415_vm1, %v410_v27  ;;  %v339_v27 = vld [vmem:[%s1475_s10 + $0x20] sm:$0xff] }
 0x21b   : > { %v412_v29 = vpop.f32.mrf.mxu3 }
 0x21c   : > { %v413_v30 = vadd.f32 %v1516_v9, %v412_v29 }
 0x21e   : > { %423 = vst.msk [vmem:[#allocation2 + $0x38] sm:$0xff] %vm415_vm1, %v413_v30 }
 0x262   : > { %v511_v46 = vpop.permute.xlu2 %510 }
 0x263   : > { %1180 = vmatmul.msk.f32.vlgmr.msra.gmra.mxu2 %vm431_vm8, %v511_v46 }
 0x264   : > { %970 = vmatpush.msra.mxu2 %v1462_v1 }
 0x266   : > { %971 = vmatpush.msra.mxu2 %v1470_v3 }
 0x268   : > { %972 = vmatpush.msra.mxu2 %v1477_v4  ;;  %v397_v4 = vpop.f32.mrf.mxu0 }
 0x26a   : > { %973 = vmatpush.msra.mxu2 %v1487_v7  ;;  %v398_v7 = vadd.f32 %v1516_v9, %v397_v4 }
 0x26c   : > { %418 = vst.msk [vmem:[#allocation2 + $0x10] sm:$0xff] %vm415_vm1, %v398_v7 }
 0x273   : > { %v582_v35 = vld [vmem:[#allocation2 + $0x10] sm:$0xff] }
 0x2e6   : > { %v531_v49 = vpop.f32.mrf.mxu2 }
 0x2e7   : > { %v554_v50 = vadd.f32 %v531_v49, %v1519_v12  ;;  %v534_v52 = vadd.f32 %v531_v49, %v508_v51 }
 0x2e9   : > { %556 = vrot.lane.b32.xlu0 %v554_v50, %s1363_s14  ;;  %v1181_v53 = vmul.f32 -1.442695, %v534_v52 }
 0x2eb   : > { %1257 = vpow2.f32 %v1181_v53 }
 0x2f1   : > { %v1258_v54 = vpop.eup %1257  ;;  %577 = vperm.xlu0 %1247, %v575_v56  }
 0x2f2   : > { %v538_v55 = vadd.f32 1.0, %v1258_v54 }
 0x2f4   : > { %1259 = vrcp.f32 %v538_v55  ;;  %v550_v63 = vand.u32 2147483648, %v538_v55  ;;  %vm544_vm12 = vweird.f32 %v538_v55  ;;  %v548_v0 = vand.u32 2147483647, %v538_v55 }
 0x2f6   : > { %v551_v5 = vor.u32 1.1754944e-38, %v550_v63  ;;  %vm549_vm14 = vcmp.eq.f32.partialorder %v548_v0, 8.507059e+37 }
 0x2f9   : > { %651 = vperm.xlu0 %1247, %v649_v58  }
 0x2fa   : > { %v1260_v57 = vpop.eup %1259 }
 0x2fb   : > { %v540_v59 = vmul.f32 %v1260_v57, %v538_v55  ;;  %vm545_vm11 = vweird.f32 %v1260_v57  ;;  %v338_v55 = vld [vmem:[%s1475_s10 + $0x18] sm:$0xff] }
 0x2fc   : > { %vm546_vm13 = vmor %vm544_vm12, %vm545_vm11  ;;  %1174 = vmatmul.msk.f32.gmra.mxu0 %vm349_vm0, %v338_v55 }
 0x2fd   : > { %v541_v60 = vsub.f32 1.0, %v540_v59 }
 0x2ff   : > { %v542_v61 = vmul.f32 %v1260_v57, %v541_v60 }
 0x301   : > { %v543_v62 = vadd.f32 %v1260_v57, %v542_v61 }
 0x303   : > { %v547_v2 = vsel %vm546_vm13, %v1260_v57, %v543_v62 }
 0x304   : > { %v552_v8 = vsel %vm549_vm14, %v551_v5, %v547_v2  ;;  %1175 = vmatmul.msk.f32.gmra.mxu0 %vm349_vm0, %v339_v27 }
 0x305   : > { %v566_v19 = vsub.f32 1.0, %v552_v8  ;;  %v572_v22 = vmul.f32 %v552_v8, %v1539_v45 }
 0x35b   : > { %v557_v6 = vpop.permute.xlu0 %556 }
 0x35c   : > { %v559_v10 = vmul.f32 %v557_v6, %v552_v8  ;;  %v723_v8 = vsel %vm722_vm7, 1, %v1365_v33 }
 0x35e   : > { %561 = vrot.lane.b32.xlu1 %v559_v10, %s1363_s14 }
 0x363   : > { %v578_v21 = vpop.permute.xlu0 %577 }
 0x364   : > { %vm579_vm15 = vcmp.eq.s32.totalorder %v578_v21, 1 }
 0x36b   : > { %v652_v58 = vpop.permute.xlu0 %651 }
 0x36c   : > { %vm653_vm6 = vcmp.eq.s32.totalorder %v652_v58, 1 }
 0x379   : > { %v400_v63 = vpop.f32.mrf.mxu0 }
 0x37a   : > { %v401_v0 = vadd.f32 %v1516_v9, %v400_v63 }
 0x37c   : > { %419 = vst.msk [vmem:[#allocation2 + $0x18] sm:$0xff] %vm415_vm1, %v401_v0 }
 0x383   : > { %v656_v10 = vld [vmem:[#allocation2 + $0x18] sm:$0xff] }
 0x3d0   : > { %v562_v11 = vpop.permute.xlu1 %561 }
 0x3d1   : > { %v564_v13 = vadd.f32 %v562_v11, %v508_v51 }
 0x3d3   : > { %1261 = vtanh.f32 %v564_v13 }
 0x3d9   : > { %v1262_v14 = vpop.eup %1261 }
 0x3da   : > { %568 = vrot.lane.b32.xlu2 %v1262_v14, %s1366_s9 }
 0x434   : > { %v569_v20 = vpop.permute.xlu2 %568 }
 0x435   : > { %v571_v23 = vmul.f32 %v569_v20, %v566_v19 }
 0x437   : > { %v573_v1 = vadd.f32 %v572_v22, %v571_v23 }
 0x439   : > { %v580_v3 = vsel %vm579_vm15, %v573_v1, %v1539_v45 }
 0x43a   : > { %584 = vrot.lane.b32.xlu1 %v580_v3, %s1366_s9 }
 0x4ac   : > { %v585_v28 = vpop.permute.xlu1 %584 }
 0x4ad   : > { %1182 = vmatmul.msk.f32.vlgmr.msrb.gmra.mxu3 %vm431_vm8, %v585_v28 }
 0x530   : > { %v605_v31 = vpop.f32.mrf.mxu3 }
 0x531   : > { %v628_v34 = vadd.f32 %v605_v31, %v1519_v12  ;;  %v608_v36 = vadd.f32 %v605_v31, %v582_v35 }
 0x533   : > { %630 = vrot.lane.b32.xlu2 %v628_v34, %s1363_s14  ;;  %v1183_v37 = vmul.f32 -1.442695, %v608_v36 }
 0x535   : > { %1263 = vpow2.f32 %v1183_v37  ;;  %v403_v37 = vpop.f32.mrf.mxu0 }
 0x53b   : > { %v1264_v38 = vpop.eup %1263 }
 0x53c   : > { %v612_v39 = vadd.f32 1.0, %v1264_v38  ;;  %v404_v38 = vadd.f32 %v1516_v9, %v403_v37 }
 0x53e   : > { %1265 = vrcp.f32 %v612_v39  ;;  %v624_v45 = vand.u32 2147483648, %v612_v39  ;;  %vm618_vm3 = vweird.f32 %v612_v39  ;;  %v622_v46 = vand.u32 2147483647, %v612_v39  ;;  %420 = vst.msk [vmem:[#allocation2 + $0x20] sm:$0xff] %vm415_vm1, %v404_v38 }
 0x540   : > { %v625_v48 = vor.u32 1.1754944e-38, %v624_v45  ;;  %vm623_vm5 = vcmp.eq.f32.partialorder %v622_v46, 8.507059e+37 }
 0x544   : > { %v1266_v40 = vpop.eup %1265 }
 0x545   : > { %v614_v41 = vmul.f32 %v1266_v40, %v612_v39  ;;  %vm619_vm2 = vweird.f32 %v1266_v40 }
 0x546   : > { %vm620_vm4 = vmor %vm618_vm3, %vm619_vm2  ;;  %vm796_vm2 = vcmp.gt.s32.totalorder %v1529_v32, 4 }
 0x547   : > { %v615_v42 = vsub.f32 1.0, %v614_v41  ;;  %v797_v58 = vsel %vm796_vm2, 1, %v1365_v33 }
 0x549   : > { %v616_v43 = vmul.f32 %v1266_v40, %v615_v42  ;;  %v730_v42 = vld [vmem:[#allocation2 + $0x20] sm:$0xff] }
 0x54b   : > { %v617_v44 = vadd.f32 %v1266_v40, %v616_v43 }
 0x54d   : > { %v621_v47 = vsel %vm620_vm4, %v1266_v40, %v617_v44  ;;  %vm870_vm4 = vcmp.gt.s32.totalorder %v1529_v32, 5 }
 0x54e   : > { %v626_v50 = vsel %vm623_vm5, %v625_v48, %v621_v47 }
 0x54f   : > { %v640_v56 = vsub.f32 1.0, %v626_v50  ;;  %v646_v59 = vmul.f32 %v626_v50, %v580_v3 }
 0x58d   : > { %v631_v49 = vpop.permute.xlu2 %630 }
 0x58e   : > { %v633_v51 = vmul.f32 %v631_v49, %v626_v50 }
 0x590   : > { %635 = vrot.lane.b32.xlu1 %v633_v51, %s1363_s14 }
 0x602   : > { %v636_v52 = vpop.permute.xlu1 %635 }
 0x603   : > { %v638_v53 = vadd.f32 %v636_v52, %v582_v35 }
 0x605   : > { %1267 = vtanh.f32 %v638_v53 }
 0x60b   : > { %v1268_v54 = vpop.eup %1267 }
 0x60c   : > { %642 = vrot.lane.b32.xlu2 %v1268_v54, %s1366_s9 }
 0x666   : > { %v643_v57 = vpop.permute.xlu2 %642 }
 0x667   : > { %v645_v60 = vmul.f32 %v643_v57, %v640_v56 }
 0x669   : > { %v647_v61 = vadd.f32 %v646_v59, %v645_v60 }
 0x66b   : > { %v654_v62 = vsel %vm653_vm6, %v647_v61, %v580_v3 }
 0x66c   : > { %658 = vrot.lane.b32.xlu1 %v654_v62, %s1366_s9 }
 0x6de   : > { %v659_v2 = vpop.permute.xlu1 %658 }
 0x6df   : > { %1184 = vmatmul.msk.f32.vlgmr.msrb.gmra.mxu1 %vm431_vm8, %v659_v2 }
 0x75c   : > { %v679_v5 = vpop.f32.mrf.mxu1 }
 0x75d   : > { %v702_v6 = vadd.f32 %v679_v5, %v1519_v12  ;;  %v682_v11 = vadd.f32 %v679_v5, %v656_v10 }
 0x75f   : > { %704 = vrot.lane.b32.xlu2 %v702_v6, %s1363_s14  ;;  %v1185_v13 = vmul.f32 -1.442695, %v682_v11 }
 0x761   : > { %1269 = vpow2.f32 %v1185_v13 }
 0x767   : > { %725 = vperm.xlu2 %1246, %v723_v8   ;;  %v1270_v14 = vpop.eup %1269 }
 0x768   : > { %v686_v15 = vadd.f32 1.0, %v1270_v14  ;;  %v871_v14 = vsel %vm870_vm4, 1, %v1365_v33 }
 0x76a   : > { %1271 = vrcp.f32 %v686_v15  ;;  %v698_v21 = vand.u32 2147483648, %v686_v15  ;;  %vm692_vm10 = vweird.f32 %v686_v15  ;;  %v696_v22 = vand.u32 2147483647, %v686_v15 }
 0x76c   : > { %v699_v1 = vor.u32 1.1754944e-38, %v698_v21  ;;  %vm697_vm12 = vcmp.eq.f32.partialorder %v696_v22, 8.507059e+37 }
 0x770   : > { %v1272_v16 = vpop.eup %1271 }
 0x771   : > { %v688_v17 = vmul.f32 %v1272_v16, %v686_v15  ;;  %vm693_vm9 = vweird.f32 %v1272_v16  ;;  %v804_v15 = vld [vmem:[#allocation2 + $0x28] sm:$0xff] }
 0x772   : > { %vm694_vm11 = vmor %vm692_vm10, %vm693_vm9 }
 0x773   : > { %v689_v18 = vsub.f32 1.0, %v688_v17 }
 0x775   : > { %v690_v19 = vmul.f32 %v1272_v16, %v689_v18 }
 0x777   : > { %v691_v20 = vadd.f32 %v1272_v16, %v690_v19 }
 0x779   : > { %v695_v23 = vsel %vm694_vm11, %v1272_v16, %v691_v20  ;;  %vm944_vm11 = vcmp.gt.s32.totalorder %v1529_v32, 6 }
 0x77a   : > { %v700_v4 = vsel %vm697_vm12, %v699_v1, %v695_v23 }
 0x77b   : > { %v714_v28 = vsub.f32 1.0, %v700_v4  ;;  %v720_v31 = vmul.f32 %v700_v4, %v654_v62 }
 0x7b9   : > { %v705_v3 = vpop.permute.xlu2 %704 }
 0x7ba   : > { %v707_v7 = vmul.f32 %v705_v3, %v700_v4 }
 0x7bc   : > { %709 = vrot.lane.b32.xlu0 %v707_v7, %s1363_s14 }
 0x7c1   : > { %v726_v30 = vpop.permute.xlu2 %725 }
 0x7c2   : > { %vm727_vm13 = vcmp.eq.s32.totalorder %v726_v30, 1 }
 0x82e   : > { %v710_v24 = vpop.permute.xlu0 %709 }
 0x82f   : > { %v712_v25 = vadd.f32 %v710_v24, %v656_v10 }
 0x831   : > { %1273 = vtanh.f32 %v712_v25 }
 0x837   : > { %v1274_v26 = vpop.eup %1273 }
 0x838   : > { %716 = vrot.lane.b32.xlu1 %v1274_v26, %s1366_s9 }
 0x8aa   : > { %v717_v29 = vpop.permute.xlu1 %716 }
 0x8ab   : > { %v719_v34 = vmul.f32 %v717_v29, %v714_v28 }
 0x8ad   : > { %v721_v35 = vadd.f32 %v720_v31, %v719_v34 }
 0x8af   : > { %v728_v36 = vsel %vm727_vm13, %v721_v35, %v654_v62 }
 0x8b0   : > { %732 = vrot.lane.b32.xlu0 %v728_v36, %s1366_s9 }
 0x922   : > { %v733_v39 = vpop.permute.xlu0 %732 }
 0x923   : > { %1186 = vmatmul.msk.f32.vlgmr.msrb.gmra.mxu2 %vm431_vm8, %v733_v39 }
 0x9a6   : > { %v753_v40 = vpop.f32.mrf.mxu2 }
 0x9a7   : > { %v776_v41 = vadd.f32 %v753_v40, %v1519_v12  ;;  %v756_v43 = vadd.f32 %v753_v40, %v730_v42 }
 0x9a9   : > { %778 = vrot.lane.b32.xlu1 %v776_v41, %s1363_s14  ;;  %v1187_v44 = vmul.f32 -1.442695, %v756_v43  ;;  %v945_v43 = vsel %vm944_vm11, 1, %v1365_v33 }
 0x9ab   : > { %1275 = vpow2.f32 %v1187_v44  ;;  %v878_v44 = vld [vmem:[#allocation2 + $0x30] sm:$0xff] }
 0x9b1   : > { %v1276_v45 = vpop.eup %1275  ;;  %799 = vperm.xlu1 %1248, %v797_v58  }
 0x9b2   : > { %v760_v46 = vadd.f32 1.0, %v1276_v45 }
 0x9b4   : > { %1277 = vrcp.f32 %v760_v46  ;;  %v772_v51 = vand.u32 2147483648, %v760_v46  ;;  %vm766_vm1 = vweird.f32 %v760_v46  ;;  %v770_v52 = vand.u32 2147483647, %v760_v46 }
 0x9b6   : > { %v773_v54 = vor.u32 1.1754944e-38, %v772_v51  ;;  %vm771_vm15 = vcmp.eq.f32.partialorder %v770_v52, 8.507059e+37 }
 0x9ba   : > { %v1278_v47 = vpop.eup %1277 }
 0x9bb   : > { %v762_v48 = vmul.f32 %v1278_v47, %v760_v46  ;;  %vm767_vm0 = vweird.f32 %v1278_v47 }
 0x9bc   : > { %vm768_vm14 = vmor %vm766_vm1, %vm767_vm0 }
 0x9bd   : > { %v763_v9 = vsub.f32 1.0, %v762_v48 }
 0x9bf   : > { %v764_v49 = vmul.f32 %v1278_v47, %v763_v9 }
 0x9c1   : > { %v765_v50 = vadd.f32 %v1278_v47, %v764_v49 }
 0x9c3   : > { %v769_v53 = vsel %vm768_vm14, %v1278_v47, %v765_v50 }
 0x9c4   : > { %v774_v56 = vsel %vm771_vm15, %v773_v54, %v769_v53  ;;  %vm1018_vm15 = vcmp.gt.s32.totalorder %v1529_v32, 7 }
 0x9c5   : > { %v788_v62 = vsub.f32 1.0, %v774_v56  ;;  %v794_v2 = vmul.f32 %v774_v56, %v728_v36 }
 0xa1b   : > { %v779_v55 = vpop.permute.xlu1 %778 }
 0xa1c   : > { %v781_v57 = vmul.f32 %v779_v55, %v774_v56 }
 0xa1e   : > { %783 = vrot.lane.b32.xlu2 %v781_v57, %s1363_s14 }
 0xa23   : > { %v800_v63 = vpop.permute.xlu1 %799 }
 0xa24   : > { %vm801_vm3 = vcmp.eq.s32.totalorder %v800_v63, 1 }
 0xa78   : > { %v784_v59 = vpop.permute.xlu2 %783 }
 0xa79   : > { %v786_v60 = vadd.f32 %v784_v59, %v730_v42 }
 0xa7b   : > { %1279 = vtanh.f32 %v786_v60 }
 0xa81   : > { %v1280_v61 = vpop.eup %1279 }
 0xa82   : > { %790 = vrot.lane.b32.xlu0 %v1280_v61, %s1366_s9 }
 0xaf4   : > { %v791_v0 = vpop.permute.xlu0 %790 }
 0xaf5   : > { %v793_v5 = vmul.f32 %v791_v0, %v788_v62 }
 0xaf7   : > { %v795_v6 = vadd.f32 %v794_v2, %v793_v5 }
 0xaf9   : > { %v802_v8 = vsel %vm801_vm3, %v795_v6, %v728_v36 }
 0xafa   : > { %806 = vrot.lane.b32.xlu2 %v802_v8, %s1366_s9 }
 0xb54   : > { %v807_v10 = vpop.permute.xlu2 %806 }
 0xb55   : > { %1188 = vmatmul.msk.f32.vlgmr.msra.gmra.mxu3 %vm431_vm8, %v807_v10 }
 0xbd8   : > { %v827_v11 = vpop.f32.mrf.mxu3 }
 0xbd9   : > { %v850_v13 = vadd.f32 %v827_v11, %v1519_v12  ;;  %v830_v16 = vadd.f32 %v827_v11, %v804_v15 }
 0xbdb   : > { %852 = vrot.lane.b32.xlu0 %v850_v13, %s1363_s14  ;;  %v1189_v17 = vmul.f32 -1.442695, %v830_v16  ;;  %v952_v16 = vld [vmem:[#allocation2 + $0x38] sm:$0xff] }
 0xbdd   : > { %1281 = vpow2.f32 %v1189_v17 }
 0xbe3   : > { %873 = vperm.xlu0 %1247, %v871_v14   ;;  %v1282_v18 = vpop.eup %1281 }
 0xbe4   : > { %v834_v19 = vadd.f32 1.0, %v1282_v18 }
 0xbe6   : > { %1283 = vrcp.f32 %v834_v19  ;;  %v846_v3 = vand.u32 2147483648, %v834_v19  ;;  %vm840_vm6 = vweird.f32 %v834_v19  ;;  %v844_v4 = vand.u32 2147483647, %v834_v19 }
 0xbe8   : > { %v847_v24 = vor.u32 1.1754944e-38, %v846_v3  ;;  %vm845_vm9 = vcmp.eq.f32.partialorder %v844_v4, 8.507059e+37 }
 0xbec   : > { %v1284_v20 = vpop.eup %1283 }
 0xbed   : > { %v836_v21 = vmul.f32 %v1284_v20, %v834_v19  ;;  %vm841_vm5 = vweird.f32 %v1284_v20 }
 0xbee   : > { %vm842_vm7 = vmor %vm840_vm6, %vm841_vm5 }
 0xbef   : > { %v837_v22 = vsub.f32 1.0, %v836_v21 }
 0xbf1   : > { %v838_v23 = vmul.f32 %v1284_v20, %v837_v22 }
 0xbf3   : > { %v839_v1 = vadd.f32 %v1284_v20, %v838_v23 }
 0xbf5   : > { %v843_v7 = vsel %vm842_vm7, %v1284_v20, %v839_v1 }
 0xbf6   : > { %v848_v26 = vsel %vm845_vm9, %v847_v24, %v843_v7 }
 0xbf7   : > { %v862_v31 = vsub.f32 1.0, %v848_v26  ;;  %v868_v36 = vmul.f32 %v848_v26, %v802_v8 }
 0xc4d   : > { %v853_v25 = vpop.permute.xlu0 %852 }
 0xc4e   : > { %v855_v27 = vmul.f32 %v853_v25, %v848_v26 }
 0xc50   : > { %857 = vrot.lane.b32.xlu1 %v855_v27, %s1363_s14 }
 0xc55   : > { %v874_v35 = vpop.permute.xlu0 %873 }
 0xc56   : > { %vm875_vm10 = vcmp.eq.s32.totalorder %v874_v35, 1 }
 0xcc2   : > { %v858_v28 = vpop.permute.xlu1 %857 }
 0xcc3   : > { %v860_v29 = vadd.f32 %v858_v28, %v804_v15  ;;  %v1019_v15 = vsel %vm1018_vm15, 1, %v1365_v33 }
 0xcc5   : > { %1285 = vtanh.f32 %v860_v29 }
 0xccb   : > { %v1286_v30 = vpop.eup %1285 }
 0xccc   : > { %864 = vrot.lane.b32.xlu2 %v1286_v30, %s1366_s9 }
 0xd26   : > { %v865_v34 = vpop.permute.xlu2 %864 }
 0xd27   : > { %v867_v37 = vmul.f32 %v865_v34, %v862_v31 }
 0xd29   : > { %v869_v38 = vadd.f32 %v868_v36, %v867_v37 }
 0xd2b   : > { %v876_v39 = vsel %vm875_vm10, %v869_v38, %v802_v8 }
 0xd2c   : > { %880 = vrot.lane.b32.xlu1 %v876_v39, %s1366_s9 }
 0xd9e   : > { %v881_v40 = vpop.permute.xlu1 %880 }
 0xd9f   : > { %1190 = vmatmul.msk.f32.vlgmr.msra.gmra.mxu1 %vm431_vm8, %v881_v40 }
 0xe1c   : > { %v901_v41 = vpop.f32.mrf.mxu1 }
 0xe1d   : > { %v924_v42 = vadd.f32 %v901_v41, %v1519_v12  ;;  %v904_v45 = vadd.f32 %v901_v41, %v878_v44 }
 0xe1f   : > { %926 = vrot.lane.b32.xlu2 %v924_v42, %s1363_s14  ;;  %v1191_v46 = vmul.f32 -1.442695, %v904_v45 }
 0xe21   : > { %1287 = vpow2.f32 %v1191_v46 }
 0xe27   : > { %947 = vperm.xlu2 %1246, %v945_v43   ;;  %v1288_v47 = vpop.eup %1287 }
 0xe28   : > { %v908_v48 = vadd.f32 1.0, %v1288_v47 }
 0xe2a   : > { %1289 = vrcp.f32 %v908_v48  ;;  %v920_v53 = vand.u32 2147483648, %v908_v48  ;;  %vm914_vm13 = vweird.f32 %v908_v48  ;;  %v918_v54 = vand.u32 2147483647, %v908_v48 }
 0xe2c   : > { %v921_v56 = vor.u32 1.1754944e-38, %v920_v53  ;;  %vm919_vm1 = vcmp.eq.f32.partialorder %v918_v54, 8.507059e+37 }
 0xe30   : > { %v1290_v9 = vpop.eup %1289 }
 0xe31   : > { %v910_v49 = vmul.f32 %v1290_v9, %v908_v48  ;;  %vm915_vm12 = vweird.f32 %v1290_v9 }
 0xe32   : > { %vm916_vm0 = vmor %vm914_vm13, %vm915_vm12 }
 0xe33   : > { %v911_v50 = vsub.f32 1.0, %v910_v49 }
 0xe35   : > { %v912_v51 = vmul.f32 %v1290_v9, %v911_v50 }
 0xe37   : > { %v913_v52 = vadd.f32 %v1290_v9, %v912_v51 }
 0xe39   : > { %v917_v55 = vsel %vm916_vm0, %v1290_v9, %v913_v52 }
 0xe3a   : > { %v922_v58 = vsel %vm919_vm1, %v921_v56, %v917_v55 }
 0xe3b   : > { %v936_v63 = vsub.f32 1.0, %v922_v58  ;;  %v942_v5 = vmul.f32 %v922_v58, %v876_v39 }
 0xe79   : > { %v927_v57 = vpop.permute.xlu2 %926 }
 0xe7a   : > { %v929_v59 = vmul.f32 %v927_v57, %v922_v58 }
 0xe7c   : > { %931 = vrot.lane.b32.xlu0 %v929_v59, %s1363_s14 }
 0xe81   : > { %v948_v2 = vpop.permute.xlu2 %947 }
 0xe82   : > { %vm949_vm14 = vcmp.eq.s32.totalorder %v948_v2, 1 }
 0xeee   : > { %v932_v60 = vpop.permute.xlu0 %931 }
 0xeef   : > { %v934_v61 = vadd.f32 %v932_v60, %v878_v44 }
 0xef1   : > { %1291 = vtanh.f32 %v934_v61 }
 0xef7   : > { %v1292_v62 = vpop.eup %1291 }
 0xef8   : > { %938 = vrot.lane.b32.xlu1 %v1292_v62, %s1366_s9 }
 0xf6a   : > { %v939_v0 = vpop.permute.xlu1 %938 }
 0xf6b   : > { %v941_v6 = vmul.f32 %v939_v0, %v936_v63 }
 0xf6d   : > { %v943_v8 = vadd.f32 %v942_v5, %v941_v6 }
 0xf6f   : > { %v950_v10 = vsel %vm949_vm14, %v943_v8, %v876_v39 }
 0xf70   : > { %954 = vrot.lane.b32.xlu0 %v950_v10, %s1366_s9 }
 0xfe2   : > { %v955_v11 = vpop.permute.xlu0 %954 }
 0xfe3   : > { %1192 = vmatmul.msk.f32.vlgmr.msra.gmra.mxu2 %vm431_vm8, %v955_v11 }
0x1066   : > { %v975_v13 = vpop.f32.mrf.mxu2 }
0x1067   : > { %v998_v14 = vadd.f32 %v975_v13, %v1519_v12  ;;  %v978_v17 = vadd.f32 %v975_v13, %v952_v16 }
0x1069   : > { %1000 = vrot.lane.b32.xlu1 %v998_v14, %s1363_s14  ;;  %v1193_v18 = vmul.f32 -1.442695, %v978_v17 }
0x106b   : > { %1293 = vpow2.f32 %v1193_v18 }
0x1071   : > { %1021 = vperm.xlu1 %1248, %v1019_v15   ;;  %v1294_v19 = vpop.eup %1293 }
0x1072   : > { %v982_v20 = vadd.f32 1.0, %v1294_v19 }
0x1074   : > { %1295 = vrcp.f32 %v982_v20  ;;  %v994_v12 = vand.u32 2147483648, %v982_v20  ;;  %vm988_vm3 = vweird.f32 %v982_v20  ;;  %v992_v4 = vand.u32 2147483647, %v982_v20 }
0x1076   : > { %v995_v33 = vor.u32 1.1754944e-38, %v994_v12  ;;  %vm993_vm5 = vcmp.eq.f32.partialorder %v992_v4, 8.507059e+37 }
0x107a   : > { %v1296_v21 = vpop.eup %1295 }
0x107b   : > { %v984_v22 = vmul.f32 %v1296_v21, %v982_v20  ;;  %vm989_vm2 = vweird.f32 %v1296_v21 }
0x107c   : > { %vm990_vm4 = vmor %vm988_vm3, %vm989_vm2 }
0x107d   : > { %v985_v23 = vsub.f32 1.0, %v984_v22 }
0x107f   : > { %v986_v1 = vmul.f32 %v1296_v21, %v985_v23 }
0x1081   : > { %v987_v3 = vadd.f32 %v1296_v21, %v986_v1 }
0x1083   : > { %v991_v32 = vsel %vm990_vm4, %v1296_v21, %v987_v3 }
0x1084   : > { %v996_v24 = vsel %vm993_vm5, %v995_v33, %v991_v32 }
0x1085   : > { %v1010_v29 = vsub.f32 1.0, %v996_v24  ;;  %v1016_v34 = vmul.f32 %v996_v24, %v950_v10 }
0x10db   : > { %v1001_v7 = vpop.permute.xlu1 %1000 }
0x10dc   : > { %v1003_v25 = vmul.f32 %v1001_v7, %v996_v24 }
0x10de   : > { %1005 = vrot.lane.b32.xlu2 %v1003_v25, %s1363_s14  ;;  %s1043_s14 = sshll.u32 %s309_s13, 4  ;;  %s1044_s14 = int_to_ptr.vmem [resolvable:$true] %s1043_s14 }
0x10e3   : > { %v1022_v31 = vpop.permute.xlu1 %1021 }
0x10e4   : > { %vm1023_vm6 = vcmp.eq.s32.totalorder %v1022_v31, 1 }
0x1138   : > { %v1006_v26 = vpop.permute.xlu2 %1005 }
0x1139   : > { %v1008_v27 = vadd.f32 %v1006_v26, %v952_v16 }
0x113b   : > { %1297 = vtanh.f32 %v1008_v27 }
0x1141   : > { %v1298_v28 = vpop.eup %1297 }
0x1142   : > { %1012 = vrot.lane.b32.xlu0 %v1298_v28, %s1366_s9 }
0x11b4   : > { %v1013_v30 = vpop.permute.xlu0 %1012 }
0x11b5   : > { %v1015_v35 = vmul.f32 %v1013_v30, %v1010_v29 }
0x11b7   : > { %v1017_v36 = vadd.f32 %v1016_v34, %v1015_v35 }
0x11b9   : > { %v1024_v37 = vsel %vm1023_vm6, %v1017_v36, %v950_v10 }
0x11ba   : > { %1026 = vrot.lane.b32.xlu2 %v1024_v37, %s1366_s9 }
0x1214   : > { %v1027_v38 = vpop.permute.xlu2 %1026 }
0x1215   : > { %1029 = vst.msk [vmem:[%s309_s13] sm:$0xff] %vm431_vm8, %v1027_v38 }
0x1216   : > { %1326 = shalt.err (!%p1323_p3)
}
0x1217   : > { %1203 = dma.vmem_to_hbm [thread:$0]  (%p1440_p5), %s1044_s14, 128, %s1046_s15, %s1031_s16  }
0x1218 PF: > { %p1209_p4 = scmp.ge.s32.totalorder %s1361_s24, 2  ;;  %s1057_s26 = sand.u32 1, %s1349_s21  }
0x1219   : > { %s1058_s29 = scalar_lea.sflag [#allocation4], %s1057_s26 }
0x121a   : > { %p1206_p7 = pnand %p1209_p4, %p1444_p6 }
0x121c   : > { %p1207_p8 = pneg %p1206_p7 }
0x121e   : > { %1344 = dma.done.wait (%p1207_p8), %s1058_s29, 128  }
0x121f   : > { %1346 = vsyncadd (%p1207_p8), %s1058_s29, 4294967168  ;;  %p16_p9 = scmp.ge.s32.totalorder %s1427_s27, 6   ;;  %s1677_s21 = smov %s1353_s22 }
0x1220   : > { %s1678_s22 = smov %s1357_s23  ;;  %s1679_s23 = smov %s1438_s30 }
0x1221   : > { %s1680_s24 = smov %s1427_s27  ;;  %18 = sbr.rel (!%p16_p9) target bundleno = 3 (0x3), region = 101 }
0x1226   :  { %1064 = vsyncpa [#allocation4], 1 }
0x1227   :  { %1066 = vsyncpa [#allocation4 + $0x1], 1 }

</bundles_post_ra>
